<compile_context>
chip_gen: v6e
topology: v6e:2x2x1
jax: 0.10.0
libtpu: 0.0.40
codegen_flags: <defaults>
</compile_context>

<pallas_src>
import functools

import jax
import jax.numpy as jnp
from jax.experimental import pallas as pl
from jax.experimental.pallas import tpu as pltpu


# ----------------------------------------------------------------------------
# Fused kernel:  out = LeakyReLU( LayerNorm_W( (A @ B) + bias ) )
#   A : im2col patches  (M, K)   bf16     M = B*H*W (rows ordered (b, h, w))
#   B : conv weights    (K, N)   bf16     N = Cout
#   The (tm, tn) output tile contains `groups` complete W-rows, so the LayerNorm
#   reduction over W is a per-group sublane reduction inside the epilogue.
# ----------------------------------------------------------------------------
def _conv_ln_lrelu_kernel(a_ref, b_ref, bias_ref, gamma_ref, beta_ref,
                          o_ref, acc_ref, *, groups, width, eps, slope):
    k = pl.program_id(2)

    @pl.when(k == 0)
    def _():
        acc_ref[...] = jnp.zeros_like(acc_ref)

    # bf16 x bf16 -> f32 accumulate on the MXU.
    acc_ref[...] += jnp.dot(a_ref[...], b_ref[...],
                            preferred_element_type=jnp.float32)

    @pl.when(k == pl.num_programs(2) - 1)
    def _():
        y = acc_ref[...] + bias_ref[...]          # (tm, tn) + (1, tn)
        gamma = gamma_ref[...]                    # (W, 1)
        beta = beta_ref[...]                      # (W, 1)
        for i in range(groups):                   # static unroll, groups <= 16
            lo, hi = i * width, (i + 1) * width
            rows = y[lo:hi, :]                    # (W, tn) one LayerNorm row / chan
            mu = jnp.mean(rows, axis=0, keepdims=True)
            d = rows - mu
            var = jnp.mean(d * d, axis=0, keepdims=True)
            yn = d * jax.lax.rsqrt(var + eps)
            z = yn * gamma + beta                 # LayerNorm affine (per-w)
            z = jnp.where(z >= 0, z, slope * z)   # LeakyReLU(0.2)
            o_ref[lo:hi, :] = z.astype(o_ref.dtype)


def conv3x3_layernorm_leakyrelu(x_nchw, w_hwio, conv_bias, gamma, beta,
                                *, eps=1e-5, slope=0.2):
    """block_layerNormal.forward: x (B, Cin, H, W) -> (B, Cout, H, W)."""
    B, Cin, H, W = x_nchw.shape
    Cout = w_hwio.shape[-1]
    assert W % 8 == 0, "LayerNorm width (shape) must be a multiple of 8"
    assert gamma.shape == (W,) and beta.shape == (W,)

    # im2col in NHWC, operands cast to bf16 (native MXU format).
    x_nhwc = jnp.transpose(x_nchw, (0, 2, 3, 1)).astype(jnp.float32)
    xp = jnp.pad(x_nhwc, ((0, 0), (1, 1), (1, 1), (0, 0)))
    patches = jnp.concatenate(
        [xp[:, dy:dy + H, dx:dx + W, :] for dy in range(3) for dx in range(3)],
        axis=-1)                                           # (B, H, W, 9*Cin)
    K = 9 * Cin
    M = B * H * W
    a = patches.reshape(M, K).astype(jnp.bfloat16)
    bmat = w_hwio.reshape(K, Cout).astype(jnp.bfloat16)

    # --- K tiling: only pad (to a multiple of 128) when K actually needs tiles ---
    if K <= 512:
        Kp, tk = K, K
    else:
        Kp = ((K + 127) // 128) * 128
        tk = 512 if Kp % 512 == 0 else (256 if Kp % 256 == 0 else 128)
        a = jnp.pad(a, ((0, 0), (0, Kp - K)))
        bmat = jnp.pad(bmat, ((0, Kp - K), (0, 0)))

    # --- N tiling (channels on the lane dim of the output tile) ---
    if Cout <= 512:
        Np, tn = Cout, Cout
    else:
        Np = ((Cout + 127) // 128) * 128
        tn = 256 if Np % 256 == 0 else 128
        bmat = jnp.pad(bmat, ((0, 0), (0, Np - Cout)))
    bias_row = jnp.pad(conv_bias.astype(jnp.float32).reshape(1, Cout),
                       ((0, 0), (0, Np - Cout)))

    # --- M tiling: each tile carries `g` complete LayerNorm rows (tm = g*W) ---
    g = max(1, min(256 // W, 16, B * H))
    while (B * H) % g != 0:
        g -= 1
    tm = g * W

    gamma_col = gamma.astype(jnp.float32).reshape(W, 1)
    beta_col = beta.astype(jnp.float32).reshape(W, 1)

    grid = ((B * H) // g, Np // tn, Kp // tk)
    out = pl.pallas_call(
        functools.partial(_conv_ln_lrelu_kernel, groups=g, width=W,
                          eps=eps, slope=slope),
        out_shape=jax.ShapeDtypeStruct((M, Np), jnp.float32),
        grid_spec=pltpu.PrefetchScalarGridSpec(
            num_scalar_prefetch=0,
            grid=grid,
            in_specs=[
                pl.BlockSpec((tm, tk), lambda m, n, k: (m, k)),   # im2col A tile
                pl.BlockSpec((tk, tn), lambda m, n, k: (k, n)),   # weight tile
                pl.BlockSpec((1, tn), lambda m, n, k: (0, n)),    # conv bias
                pl.BlockSpec((W, 1), lambda m, n, k: (0, 0)),     # LN gamma
                pl.BlockSpec((W, 1), lambda m, n, k: (0, 0)),     # LN beta
            ],
            out_specs=pl.BlockSpec((tm, tn), lambda m, n, k: (m, n)),
            scratch_shapes=[pltpu.VMEM((tm, tn), jnp.float32)],
        ),
        compiler_params=pltpu.CompilerParams(
            dimension_semantics=("parallel", "parallel", "arbitrary"),
            vmem_limit_bytes=32 * 1024 * 1024),
    )(a, bmat, bias_row, gamma_col, beta_col)

    out = out[:, :Cout].reshape(B, H, W, Cout)
    return jnp.transpose(out, (0, 3, 1, 2))                 # (B, Cout, H, W)


# ----------------------------------------------------------------------------
# Pure-JAX reference (same bf16-quantised operands) for a sanity check.
# ----------------------------------------------------------------------------
def _reference_forward(x_nchw, w_hwio, conv_bias, gamma, beta,
                       eps=1e-5, slope=0.2):
    B, Cin, H, W = x_nchw.shape
    Cout = w_hwio.shape[-1]
    x_nhwc = jnp.transpose(x_nchw, (0, 2, 3, 1)).astype(jnp.float32)
    xp = jnp.pad(x_nhwc, ((0, 0), (1, 1), (1, 1), (0, 0)))
    patches = jnp.concatenate(
        [xp[:, dy:dy + H, dx:dx + W, :] for dy in range(3) for dx in range(3)],
        axis=-1).reshape(B * H * W, 9 * Cin).astype(jnp.bfloat16)
    wmat = w_hwio.reshape(9 * Cin, Cout).astype(jnp.bfloat16)
    y = jnp.dot(patches, wmat, preferred_element_type=jnp.float32)
    y = y + conv_bias.astype(jnp.float32)[None, :]
    y = jnp.transpose(y.reshape(B, H, W, Cout), (0, 3, 1, 2))   # (B, C, H, W)
    mu = jnp.mean(y, axis=-1, keepdims=True)
    var = jnp.mean((y - mu) ** 2, axis=-1, keepdims=True)
    z = (y - mu) * jax.lax.rsqrt(var + eps) * gamma + beta
    return jnp.where(z >= 0, z, slope * z)


if __name__ == "__main__":
    batch = 2
    in_filters = 4
    n_filters = 32
    shape = 16            # spatial size == LayerNorm normalized_shape

    key = jax.random.PRNGKey(0)
    kx, kw, kb, kg, kbt = jax.random.split(key, 5)
    x = jax.random.normal(kx, (batch, in_filters, shape, shape), jnp.float32)
    w = 0.1 * jax.random.normal(kw, (3, 3, in_filters, n_filters), jnp.float32)
    conv_bias = 0.1 * jax.random.normal(kb, (n_filters,), jnp.float32)
    gamma = 1.0 + 0.1 * jax.random.normal(kg, (shape,), jnp.float32)
    beta = 0.1 * jax.random.normal(kbt, (shape,), jnp.float32)

    fwd = jax.jit(lambda inp: conv3x3_layernorm_leakyrelu(
        inp, w, conv_bias, gamma, beta))
    out = jax.block_until_ready(fwd(x))

    assert out.shape == (batch, n_filters, shape, shape), out.shape
    assert bool(jnp.all(jnp.isfinite(out)))

    ref = jax.block_until_ready(
        jax.jit(lambda inp: _reference_forward(inp, w, conv_bias, gamma, beta))(x))
    max_err = float(jnp.max(jnp.abs(out - ref)))
    assert max_err < 1e-2, f"mismatch vs reference: {max_err}"

    print("KERNEL_OK")
</pallas_src>

<mosaic_0001>
module attributes {stable_mosaic.version = 11 : i64} {
  func.func @_conv_ln_lrelu_kernel(%arg0: i32, %arg1: i32, %arg2: i32, %arg3: memref<256x36xbf16, #tpu.memory_space<vmem>>, %arg4: memref<36x32xbf16, #tpu.memory_space<vmem>>, %arg5: memref<1x32xf32, #tpu.memory_space<vmem>>, %arg6: memref<16x1xf32, #tpu.memory_space<vmem>>, %arg7: memref<16x1xf32, #tpu.memory_space<vmem>>, %arg8: memref<256x32xf32, #tpu.memory_space<vmem>>, %arg9: memref<256x32xf32, #tpu.memory_space<vmem>>) attributes {dimension_semantics = [#tpu.dimension_semantics<parallel>, #tpu.dimension_semantics<parallel>, #tpu.dimension_semantics<arbitrary>], iteration_bounds = array<i64: 2, 1, 1>, scalar_prefetch = 0 : i64, scratch_operands = 1 : i64, tpu.core_type = #tpu.core_type<tc>, window_params = [{transform_indices = @transform_0, window_bounds = array<i64: 256, 36>}, {transform_indices = @transform_1, window_bounds = array<i64: 36, 32>}, {transform_indices = @transform_2, window_bounds = array<i64: 1, 32>}, {pipeline_mode = #tpu.pipeline_mode<synchronous>, transform_indices = @transform_3, window_bounds = array<i64: 16, 1>}, {pipeline_mode = #tpu.pipeline_mode<synchronous>, transform_indices = @transform_4, window_bounds = array<i64: 16, 1>}, {transform_indices = @transform_5, window_bounds = array<i64: 256, 32>}]} {
    %c0_i32 = arith.constant 0 : i32
    %0 = arith.cmpi eq, %arg2, %c0_i32 : i32
    %1 = arith.extui %0 : i1 to i32
    %c0_i32_0 = arith.constant 0 : i32
    %2 = arith.cmpi ne, %1, %c0_i32_0 : i32
    scf.if %2 {
      %cst_10 = arith.constant 0.000000e+00 : f32
      %12 = vector.broadcast %cst_10 : f32 to vector<256x32xf32>
      %c0_11 = arith.constant 0 : index
      %c0_12 = arith.constant 0 : index
      %13 = vector.load %arg9[%c0_11, %c0_12] : memref<256x32xf32, #tpu.memory_space<vmem>>, vector<256x32xf32>
      tpu.vector_store %arg9[%c0_11, %c0_12], %12 {strides = array<i32>} : memref<256x32xf32, #tpu.memory_space<vmem>>, vector<256x32xf32>,
    } else {
    }
    %c0 = arith.constant 0 : index
    %c0_1 = arith.constant 0 : index
    %3 = vector.load %arg9[%c0, %c0_1] : memref<256x32xf32, #tpu.memory_space<vmem>>, vector<256x32xf32>
    %c0_2 = arith.constant 0 : index
    %c0_3 = arith.constant 0 : index
    %4 = vector.load %arg3[%c0_2, %c0_3] : memref<256x36xbf16, #tpu.memory_space<vmem>>, vector<256x36xbf16>
    %c0_4 = arith.constant 0 : index
    %c0_5 = arith.constant 0 : index
    %5 = vector.load %arg4[%c0_4, %c0_5] : memref<36x32xbf16, #tpu.memory_space<vmem>>, vector<36x32xbf16>
    %cst = arith.constant dense<0.000000e+00> : vector<256x32xf32>
    %6 = tpu.matmul %4, %5, %cst {dimension_numbers = #tpu.dot_dimension_numbers<[1], [0], [0], [1], [0, 0, 1, 1], [], []>} : vector<256x36xbf16>, vector<36x32xbf16>, vector<256x32xf32> -> vector<256x32xf32>
    %7 = arith.addf %3, %6 : vector<256x32xf32>
    %c0_6 = arith.constant 0 : index
    %c0_7 = arith.constant 0 : index
    %8 = vector.load %arg9[%c0_6, %c0_7] : memref<256x32xf32, #tpu.memory_space<vmem>>, vector<256x32xf32>
    tpu.vector_store %arg9[%c0_6, %c0_7], %7 {strides = array<i32>} : memref<256x32xf32, #tpu.memory_space<vmem>>, vector<256x32xf32>,
    %c0_i32_8 = arith.constant 0 : i32
    %9 = arith.cmpi eq, %arg2, %c0_i32_8 : i32
    %10 = arith.extui %9 : i1 to i32
    %c0_i32_9 = arith.constant 0 : i32
    %11 = arith.cmpi ne, %10, %c0_i32_9 : i32
    scf.if %11 {
      %c0_10 = arith.constant 0 : index
      %c0_11 = arith.constant 0 : index
      %12 = vector.load %arg9[%c0_10, %c0_11] : memref<256x32xf32, #tpu.memory_space<vmem>>, vector<256x32xf32>
      %c0_12 = arith.constant 0 : index
      %c0_13 = arith.constant 0 : index
      %13 = vector.load %arg5[%c0_12, %c0_13] : memref<1x32xf32, #tpu.memory_space<vmem>>, vector<1x32xf32>
      %14 = vector.broadcast %13 : vector<1x32xf32> to vector<256x32xf32>
      %15 = arith.addf %12, %14 : vector<256x32xf32>
      %c0_14 = arith.constant 0 : index
      %c0_15 = arith.constant 0 : index
      %16 = vector.load %arg6[%c0_14, %c0_15] : memref<16x1xf32, #tpu.memory_space<vmem>>, vector<16x1xf32>
      %c0_16 = arith.constant 0 : index
      %c0_17 = arith.constant 0 : index
      %17 = vector.load %arg7[%c0_16, %c0_17] : memref<16x1xf32, #tpu.memory_space<vmem>>, vector<16x1xf32>
      %18 = vector.extract_strided_slice %15 {offsets = [0, 0], sizes = [16, 32], strides = [1, 1]} : vector<256x32xf32> to vector<16x32xf32>
      %cst_18 = arith.constant dense<0.000000e+00> : vector<32xf32>
      %19 = vector.multi_reduction <add>, %18, %cst_18 [0] : vector<16x32xf32> to vector<32xf32>
      %20 = vector.shape_cast %19 : vector<32xf32> to vector<1x32xf32>
      %cst_19 = arith.constant 1.600000e+01 : f32
      %21 = vector.broadcast %cst_19 : f32 to vector<1x32xf32>
      %22 = arith.divf %20, %21 : vector<1x32xf32>
      %23 = vector.broadcast %22 : vector<1x32xf32> to vector<16x32xf32>
      %24 = arith.subf %18, %23 : vector<16x32xf32>
      %25 = arith.mulf %24, %24 : vector<16x32xf32>
      %cst_20 = arith.constant dense<0.000000e+00> : vector<32xf32>
      %26 = vector.multi_reduction <add>, %25, %cst_20 [0] : vector<16x32xf32> to vector<32xf32>
      %27 = vector.shape_cast %26 : vector<32xf32> to vector<1x32xf32>
      %cst_21 = arith.constant 1.600000e+01 : f32
      %28 = vector.broadcast %cst_21 : f32 to vector<1x32xf32>
      %29 = arith.divf %27, %28 : vector<1x32xf32>
      %cst_22 = arith.constant 9.99999974E-6 : f32
      %30 = vector.broadcast %cst_22 : f32 to vector<1x32xf32>
      %31 = arith.addf %29, %30 : vector<1x32xf32>
      %32 = math.rsqrt %31 : vector<1x32xf32>
      %33 = vector.broadcast %32 : vector<1x32xf32> to vector<16x32xf32>
      %34 = arith.mulf %24, %33 : vector<16x32xf32>
      %35 = vector.broadcast %16 : vector<16x1xf32> to vector<16x32xf32>
      %36 = arith.mulf %34, %35 : vector<16x32xf32>
      %37 = vector.broadcast %17 : vector<16x1xf32> to vector<16x32xf32>
      %38 = arith.addf %36, %37 : vector<16x32xf32>
      %cst_23 = arith.constant 0.000000e+00 : f32
      %39 = vector.broadcast %cst_23 : f32 to vector<16x32xf32>
      %40 = arith.cmpf oge, %38, %39 : vector<16x32xf32>
      %cst_24 = arith.constant 2.000000e-01 : f32
      %41 = vector.broadcast %cst_24 : f32 to vector<16x32xf32>
      %42 = arith.mulf %41, %38 : vector<16x32xf32>
      %43 = arith.select %40, %38, %42 : vector<16x32xi1>, vector<16x32xf32>
      %c0_25 = arith.constant 0 : index
      %c0_26 = arith.constant 0 : index
      %44 = vector.load %arg8[%c0_25, %c0_26] : memref<256x32xf32, #tpu.memory_space<vmem>>, vector<16x32xf32>
      tpu.vector_store %arg8[%c0_25, %c0_26], %43 {strides = array<i32>} : memref<256x32xf32, #tpu.memory_space<vmem>>, vector<16x32xf32>,
      %45 = vector.extract_strided_slice %15 {offsets = [16, 0], sizes = [16, 32], strides = [1, 1]} : vector<256x32xf32> to vector<16x32xf32>
      %cst_27 = arith.constant dense<0.000000e+00> : vector<32xf32>
      %46 = vector.multi_reduction <add>, %45, %cst_27 [0] : vector<16x32xf32> to vector<32xf32>
      %47 = vector.shape_cast %46 : vector<32xf32> to vector<1x32xf32>
      %cst_28 = arith.constant 1.600000e+01 : f32
      %48 = vector.broadcast %cst_28 : f32 to vector<1x32xf32>
      %49 = arith.divf %47, %48 : vector<1x32xf32>
      %50 = vector.broadcast %49 : vector<1x32xf32> to vector<16x32xf32>
      %51 = arith.subf %45, %50 : vector<16x32xf32>
      %52 = arith.mulf %51, %51 : vector<16x32xf32>
      %cst_29 = arith.constant dense<0.000000e+00> : vector<32xf32>
      %53 = vector.multi_reduction <add>, %52, %cst_29 [0] : vector<16x32xf32> to vector<32xf32>
      %54 = vector.shape_cast %53 : vector<32xf32> to vector<1x32xf32>
      %cst_30 = arith.constant 1.600000e+01 : f32
      %55 = vector.broadcast %cst_30 : f32 to vector<1x32xf32>
      %56 = arith.divf %54, %55 : vector<1x32xf32>
      %cst_31 = arith.constant 9.99999974E-6 : f32
      %57 = vector.broadcast %cst_31 : f32 to vector<1x32xf32>
      %58 = arith.addf %56, %57 : vector<1x32xf32>
      %59 = math.rsqrt %58 : vector<1x32xf32>
      %60 = vector.broadcast %59 : vector<1x32xf32> to vector<16x32xf32>
      %61 = arith.mulf %51, %60 : vector<16x32xf32>
      %62 = vector.broadcast %16 : vector<16x1xf32> to vector<16x32xf32>
      %63 = arith.mulf %61, %62 : vector<16x32xf32>
      %64 = vector.broadcast %17 : vector<16x1xf32> to vector<16x32xf32>
      %65 = arith.addf %63, %64 : vector<16x32xf32>
      %cst_32 = arith.constant 0.000000e+00 : f32
      %66 = vector.broadcast %cst_32 : f32 to vector<16x32xf32>
      %67 = arith.cmpf oge, %65, %66 : vector<16x32xf32>
      %cst_33 = arith.constant 2.000000e-01 : f32
      %68 = vector.broadcast %cst_33 : f32 to vector<16x32xf32>
      %69 = arith.mulf %68, %65 : vector<16x32xf32>
      %70 = arith.select %67, %65, %69 : vector<16x32xi1>, vector<16x32xf32>
      %c16 = arith.constant 16 : index
      %c0_34 = arith.constant 0 : index
      %71 = vector.load %arg8[%c16, %c0_34] : memref<256x32xf32, #tpu.memory_space<vmem>>, vector<16x32xf32>
      tpu.vector_store %arg8[%c16, %c0_34], %70 {strides = array<i32>} : memref<256x32xf32, #tpu.memory_space<vmem>>, vector<16x32xf32>,
      %72 = vector.extract_strided_slice %15 {offsets = [32, 0], sizes = [16, 32], strides = [1, 1]} : vector<256x32xf32> to vector<16x32xf32>
      %cst_35 = arith.constant dense<0.000000e+00> : vector<32xf32>
      %73 = vector.multi_reduction <add>, %72, %cst_35 [0] : vector<16x32xf32> to vector<32xf32>
      %74 = vector.shape_cast %73 : vector<32xf32> to vector<1x32xf32>
      %cst_36 = arith.constant 1.600000e+01 : f32
      %75 = vector.broadcast %cst_36 : f32 to vector<1x32xf32>
      %76 = arith.divf %74, %75 : vector<1x32xf32>
      %77 = vector.broadcast %76 : vector<1x32xf32> to vector<16x32xf32>
      %78 = arith.subf %72, %77 : vector<16x32xf32>
      %79 = arith.mulf %78, %78 : vector<16x32xf32>
      %cst_37 = arith.constant dense<0.000000e+00> : vector<32xf32>
      %80 = vector.multi_reduction <add>, %79, %cst_37 [0] : vector<16x32xf32> to vector<32xf32>
      %81 = vector.shape_cast %80 : vector<32xf32> to vector<1x32xf32>
      %cst_38 = arith.constant 1.600000e+01 : f32
      %82 = vector.broadcast %cst_38 : f32 to vector<1x32xf32>
      %83 = arith.divf %81, %82 : vector<1x32xf32>
      %cst_39 = arith.constant 9.99999974E-6 : f32
      %84 = vector.broadcast %cst_39 : f32 to vector<1x32xf32>
      %85 = arith.addf %83, %84 : vector<1x32xf32>
      %86 = math.rsqrt %85 : vector<1x32xf32>
      %87 = vector.broadcast %86 : vector<1x32xf32> to vector<16x32xf32>
      %88 = arith.mulf %78, %87 : vector<16x32xf32>
      %89 = vector.broadcast %16 : vector<16x1xf32> to vector<16x32xf32>
      %90 = arith.mulf %88, %89 : vector<16x32xf32>
      %91 = vector.broadcast %17 : vector<16x1xf32> to vector<16x32xf32>
      %92 = arith.addf %90, %91 : vector<16x32xf32>
      %cst_40 = arith.constant 0.000000e+00 : f32
      %93 = vector.broadcast %cst_40 : f32 to vector<16x32xf32>
      %94 = arith.cmpf oge, %92, %93 : vector<16x32xf32>
      %cst_41 = arith.constant 2.000000e-01 : f32
      %95 = vector.broadcast %cst_41 : f32 to vector<16x32xf32>
      %96 = arith.mulf %95, %92 : vector<16x32xf32>
      %97 = arith.select %94, %92, %96 : vector<16x32xi1>, vector<16x32xf32>
      %c32 = arith.constant 32 : index
      %c0_42 = arith.constant 0 : index
      %98 = vector.load %arg8[%c32, %c0_42] : memref<256x32xf32, #tpu.memory_space<vmem>>, vector<16x32xf32>
      tpu.vector_store %arg8[%c32, %c0_42], %97 {strides = array<i32>} : memref<256x32xf32, #tpu.memory_space<vmem>>, vector<16x32xf32>,
      %99 = vector.extract_strided_slice %15 {offsets = [48, 0], sizes = [16, 32], strides = [1, 1]} : vector<256x32xf32> to vector<16x32xf32>
      %cst_43 = arith.constant dense<0.000000e+00> : vector<32xf32>
      %100 = vector.multi_reduction <add>, %99, %cst_43 [0] : vector<16x32xf32> to vector<32xf32>
      %101 = vector.shape_cast %100 : vector<32xf32> to vector<1x32xf32>
      %cst_44 = arith.constant 1.600000e+01 : f32
      %102 = vector.broadcast %cst_44 : f32 to vector<1x32xf32>
      %103 = arith.divf %101, %102 : vector<1x32xf32>
      %104 = vector.broadcast %103 : vector<1x32xf32> to vector<16x32xf32>
      %105 = arith.subf %99, %104 : vector<16x32xf32>
      %106 = arith.mulf %105, %105 : vector<16x32xf32>
      %cst_45 = arith.constant dense<0.000000e+00> : vector<32xf32>
      %107 = vector.multi_reduction <add>, %106, %cst_45 [0] : vector<16x32xf32> to vector<32xf32>
      %108 = vector.shape_cast %107 : vector<32xf32> to vector<1x32xf32>
      %cst_46 = arith.constant 1.600000e+01 : f32
      %109 = vector.broadcast %cst_46 : f32 to vector<1x32xf32>
      %110 = arith.divf %108, %109 : vector<1x32xf32>
      %cst_47 = arith.constant 9.99999974E-6 : f32
      %111 = vector.broadcast %cst_47 : f32 to vector<1x32xf32>
      %112 = arith.addf %110, %111 : vector<1x32xf32>
      %113 = math.rsqrt %112 : vector<1x32xf32>
      %114 = vector.broadcast %113 : vector<1x32xf32> to vector<16x32xf32>
      %115 = arith.mulf %105, %114 : vector<16x32xf32>
      %116 = vector.broadcast %16 : vector<16x1xf32> to vector<16x32xf32>
      %117 = arith.mulf %115, %116 : vector<16x32xf32>
      %118 = vector.broadcast %17 : vector<16x1xf32> to vector<16x32xf32>
      %119 = arith.addf %117, %118 : vector<16x32xf32>
      %cst_48 = arith.constant 0.000000e+00 : f32
      %120 = vector.broadcast %cst_48 : f32 to vector<16x32xf32>
      %121 = arith.cmpf oge, %119, %120 : vector<16x32xf32>
      %cst_49 = arith.constant 2.000000e-01 : f32
      %122 = vector.broadcast %cst_49 : f32 to vector<16x32xf32>
      %123 = arith.mulf %122, %119 : vector<16x32xf32>
      %124 = arith.select %121, %119, %123 : vector<16x32xi1>, vector<16x32xf32>
      %c48 = arith.constant 48 : index
      %c0_50 = arith.constant 0 : index
      %125 = vector.load %arg8[%c48, %c0_50] : memref<256x32xf32, #tpu.memory_space<vmem>>, vector<16x32xf32>
      tpu.vector_store %arg8[%c48, %c0_50], %124 {strides = array<i32>} : memref<256x32xf32, #tpu.memory_space<vmem>>, vector<16x32xf32>,
      %126 = vector.extract_strided_slice %15 {offsets = [64, 0], sizes = [16, 32], strides = [1, 1]} : vector<256x32xf32> to vector<16x32xf32>
      %cst_51 = arith.constant dense<0.000000e+00> : vector<32xf32>
      %127 = vector.multi_reduction <add>, %126, %cst_51 [0] : vector<16x32xf32> to vector<32xf32>
      %128 = vector.shape_cast %127 : vector<32xf32> to vector<1x32xf32>
      %cst_52 = arith.constant 1.600000e+01 : f32
      %129 = vector.broadcast %cst_52 : f32 to vector<1x32xf32>
      %130 = arith.divf %128, %129 : vector<1x32xf32>
      %131 = vector.broadcast %130 : vector<1x32xf32> to vector<16x32xf32>
      %132 = arith.subf %126, %131 : vector<16x32xf32>
      %133 = arith.mulf %132, %132 : vector<16x32xf32>
      %cst_53 = arith.constant dense<0.000000e+00> : vector<32xf32>
      %134 = vector.multi_reduction <add>, %133, %cst_53 [0] : vector<16x32xf32> to vector<32xf32>
      %135 = vector.shape_cast %134 : vector<32xf32> to vector<1x32xf32>
      %cst_54 = arith.constant 1.600000e+01 : f32
      %136 = vector.broadcast %cst_54 : f32 to vector<1x32xf32>
      %137 = arith.divf %135, %136 : vector<1x32xf32>
      %cst_55 = arith.constant 9.99999974E-6 : f32
      %138 = vector.broadcast %cst_55 : f32 to vector<1x32xf32>
      %139 = arith.addf %137, %138 : vector<1x32xf32>
      %140 = math.rsqrt %139 : vector<1x32xf32>
      %141 = vector.broadcast %140 : vector<1x32xf32> to vector<16x32xf32>
      %142 = arith.mulf %132, %141 : vector<16x32xf32>
      %143 = vector.broadcast %16 : vector<16x1xf32> to vector<16x32xf32>
      %144 = arith.mulf %142, %143 : vector<16x32xf32>
      %145 = vector.broadcast %17 : vector<16x1xf32> to vector<16x32xf32>
      %146 = arith.addf %144, %145 : vector<16x32xf32>
      %cst_56 = arith.constant 0.000000e+00 : f32
      %147 = vector.broadcast %cst_56 : f32 to vector<16x32xf32>
      %148 = arith.cmpf oge, %146, %147 : vector<16x32xf32>
      %cst_57 = arith.constant 2.000000e-01 : f32
      %149 = vector.broadcast %cst_57 : f32 to vector<16x32xf32>
      %150 = arith.mulf %149, %146 : vector<16x32xf32>
      %151 = arith.select %148, %146, %150 : vector<16x32xi1>, vector<16x32xf32>
      %c64 = arith.constant 64 : index
      %c0_58 = arith.constant 0 : index
      %152 = vector.load %arg8[%c64, %c0_58] : memref<256x32xf32, #tpu.memory_space<vmem>>, vector<16x32xf32>
      tpu.vector_store %arg8[%c64, %c0_58], %151 {strides = array<i32>} : memref<256x32xf32, #tpu.memory_space<vmem>>, vector<16x32xf32>,
      %153 = vector.extract_strided_slice %15 {offsets = [80, 0], sizes = [16, 32], strides = [1, 1]} : vector<256x32xf32> to vector<16x32xf32>
      %cst_59 = arith.constant dense<0.000000e+00> : vector<32xf32>
      %154 = vector.multi_reduction <add>, %153, %cst_59 [0] : vector<16x32xf32> to vector<32xf32>
      %155 = vector.shape_cast %154 : vector<32xf32> to vector<1x32xf32>
      %cst_60 = arith.constant 1.600000e+01 : f32
      %156 = vector.broadcast %cst_60 : f32 to vector<1x32xf32>
      %157 = arith.divf %155, %156 : vector<1x32xf32>
      %158 = vector.broadcast %157 : vector<1x32xf32> to vector<16x32xf32>
      %159 = arith.subf %153, %158 : vector<16x32xf32>
      %160 = arith.mulf %159, %159 : vector<16x32xf32>
      %cst_61 = arith.constant dense<0.000000e+00> : vector<32xf32>
      %161 = vector.multi_reduction <add>, %160, %cst_61 [0] : vector<16x32xf32> to vector<32xf32>
      %162 = vector.shape_cast %161 : vector<32xf32> to vector<1x32xf32>
      %cst_62 = arith.constant 1.600000e+01 : f32
      %163 = vector.broadcast %cst_62 : f32 to vector<1x32xf32>
      %164 = arith.divf %162, %163 : vector<1x32xf32>
      %cst_63 = arith.constant 9.99999974E-6 : f32
      %165 = vector.broadcast %cst_63 : f32 to vector<1x32xf32>
      %166 = arith.addf %164, %165 : vector<1x32xf32>
      %167 = math.rsqrt %166 : vector<1x32xf32>
      %168 = vector.broadcast %167 : vector<1x32xf32> to vector<16x32xf32>
      %169 = arith.mulf %159, %168 : vector<16x32xf32>
      %170 = vector.broadcast %16 : vector<16x1xf32> to vector<16x32xf32>
      %171 = arith.mulf %169, %170 : vector<16x32xf32>
      %172 = vector.broadcast %17 : vector<16x1xf32> to vector<16x32xf32>
      %173 = arith.addf %171, %172 : vector<16x32xf32>
      %cst_64 = arith.constant 0.000000e+00 : f32
      %174 = vector.broadcast %cst_64 : f32 to vector<16x32xf32>
      %175 = arith.cmpf oge, %173, %174 : vector<16x32xf32>
      %cst_65 = arith.constant 2.000000e-01 : f32
      %176 = vector.broadcast %cst_65 : f32 to vector<16x32xf32>
      %177 = arith.mulf %176, %173 : vector<16x32xf32>
      %178 = arith.select %175, %173, %177 : vector<16x32xi1>, vector<16x32xf32>
      %c80 = arith.constant 80 : index
      %c0_66 = arith.constant 0 : index
      %179 = vector.load %arg8[%c80, %c0_66] : memref<256x32xf32, #tpu.memory_space<vmem>>, vector<16x32xf32>
      tpu.vector_store %arg8[%c80, %c0_66], %178 {strides = array<i32>} : memref<256x32xf32, #tpu.memory_space<vmem>>, vector<16x32xf32>,
      %180 = vector.extract_strided_slice %15 {offsets = [96, 0], sizes = [16, 32], strides = [1, 1]} : vector<256x32xf32> to vector<16x32xf32>
      %cst_67 = arith.constant dense<0.000000e+00> : vector<32xf32>
      %181 = vector.multi_reduction <add>, %180, %cst_67 [0] : vector<16x32xf32> to vector<32xf32>
      %182 = vector.shape_cast %181 : vector<32xf32> to vector<1x32xf32>
      %cst_68 = arith.constant 1.600000e+01 : f32
      %183 = vector.broadcast %cst_68 : f32 to vector<1x32xf32>
      %184 = arith.divf %182, %183 : vector<1x32xf32>
      %185 = vector.broadcast %184 : vector<1x32xf32> to vector<16x32xf32>
      %186 = arith.subf %180, %185 : vector<16x32xf32>
      %187 = arith.mulf %186, %186 : vector<16x32xf32>
      %cst_69 = arith.constant dense<0.000000e+00> : vector<32xf32>
      %188 = vector.multi_reduction <add>, %187, %cst_69 [0] : vector<16x32xf32> to vector<32xf32>
      %189 = vector.shape_cast %188 : vector<32xf32> to vector<1x32xf32>
      %cst_70 = arith.constant 1.600000e+01 : f32
      %190 = vector.broadcast %cst_70 : f32 to vector<1x32xf32>
      %191 = arith.divf %189, %190 : vector<1x32xf32>
      %cst_71 = arith.constant 9.99999974E-6 : f32
      %192 = vector.broadcast %cst_71 : f32 to vector<1x32xf32>
      %193 = arith.addf %191, %192 : vector<1x32xf32>
      %194 = math.rsqrt %193 : vector<1x32xf32>
      %195 = vector.broadcast %194 : vector<1x32xf32> to vector<16x32xf32>
      %196 = arith.mulf %186, %195 : vector<16x32xf32>
      %197 = vector.broadcast %16 : vector<16x1xf32> to vector<16x32xf32>
      %198 = arith.mulf %196, %197 : vector<16x32xf32>
      %199 = vector.broadcast %17 : vector<16x1xf32> to vector<16x32xf32>
      %200 = arith.addf %198, %199 : vector<16x32xf32>
      %cst_72 = arith.constant 0.000000e+00 : f32
      %201 = vector.broadcast %cst_72 : f32 to vector<16x32xf32>
      %202 = arith.cmpf oge, %200, %201 : vector<16x32xf32>
      %cst_73 = arith.constant 2.000000e-01 : f32
      %203 = vector.broadcast %cst_73 : f32 to vector<16x32xf32>
      %204 = arith.mulf %203, %200 : vector<16x32xf32>
      %205 = arith.select %202, %200, %204 : vector<16x32xi1>, vector<16x32xf32>
      %c96 = arith.constant 96 : index
      %c0_74 = arith.constant 0 : index
      %206 = vector.load %arg8[%c96, %c0_74] : memref<256x32xf32, #tpu.memory_space<vmem>>, vector<16x32xf32>
      tpu.vector_store %arg8[%c96, %c0_74], %205 {strides = array<i32>} : memref<256x32xf32, #tpu.memory_space<vmem>>, vector<16x32xf32>,
      %207 = vector.extract_strided_slice %15 {offsets = [112, 0], sizes = [16, 32], strides = [1, 1]} : vector<256x32xf32> to vector<16x32xf32>
      %cst_75 = arith.constant dense<0.000000e+00> : vector<32xf32>
      %208 = vector.multi_reduction <add>, %207, %cst_75 [0] : vector<16x32xf32> to vector<32xf32>
      %209 = vector.shape_cast %208 : vector<32xf32> to vector<1x32xf32>
      %cst_76 = arith.constant 1.600000e+01 : f32
      %210 = vector.broadcast %cst_76 : f32 to vector<1x32xf32>
      %211 = arith.divf %209, %210 : vector<1x32xf32>
      %212 = vector.broadcast %211 : vector<1x32xf32> to vector<16x32xf32>
      %213 = arith.subf %207, %212 : vector<16x32xf32>
      %214 = arith.mulf %213, %213 : vector<16x32xf32>
      %cst_77 = arith.constant dense<0.000000e+00> : vector<32xf32>
      %215 = vector.multi_reduction <add>, %214, %cst_77 [0] : vector<16x32xf32> to vector<32xf32>
      %216 = vector.shape_cast %215 : vector<32xf32> to vector<1x32xf32>
      %cst_78 = arith.constant 1.600000e+01 : f32
      %217 = vector.broadcast %cst_78 : f32 to vector<1x32xf32>
      %218 = arith.divf %216, %217 : vector<1x32xf32>
      %cst_79 = arith.constant 9.99999974E-6 : f32
      %219 = vector.broadcast %cst_79 : f32 to vector<1x32xf32>
      %220 = arith.addf %218, %219 : vector<1x32xf32>
      %221 = math.rsqrt %220 : vector<1x32xf32>
      %222 = vector.broadcast %221 : vector<1x32xf32> to vector<16x32xf32>
      %223 = arith.mulf %213, %222 : vector<16x32xf32>
      %224 = vector.broadcast %16 : vector<16x1xf32> to vector<16x32xf32>
      %225 = arith.mulf %223, %224 : vector<16x32xf32>
      %226 = vector.broadcast %17 : vector<16x1xf32> to vector<16x32xf32>
      %227 = arith.addf %225, %226 : vector<16x32xf32>
      %cst_80 = arith.constant 0.000000e+00 : f32
      %228 = vector.broadcast %cst_80 : f32 to vector<16x32xf32>
      %229 = arith.cmpf oge, %227, %228 : vector<16x32xf32>
      %cst_81 = arith.constant 2.000000e-01 : f32
      %230 = vector.broadcast %cst_81 : f32 to vector<16x32xf32>
      %231 = arith.mulf %230, %227 : vector<16x32xf32>
      %232 = arith.select %229, %227, %231 : vector<16x32xi1>, vector<16x32xf32>
      %c112 = arith.constant 112 : index
      %c0_82 = arith.constant 0 : index
      %233 = vector.load %arg8[%c112, %c0_82] : memref<256x32xf32, #tpu.memory_space<vmem>>, vector<16x32xf32>
      tpu.vector_store %arg8[%c112, %c0_82], %232 {strides = array<i32>} : memref<256x32xf32, #tpu.memory_space<vmem>>, vector<16x32xf32>,
      %234 = vector.extract_strided_slice %15 {offsets = [128, 0], sizes = [16, 32], strides = [1, 1]} : vector<256x32xf32> to vector<16x32xf32>
      %cst_83 = arith.constant dense<0.000000e+00> : vector<32xf32>
      %235 = vector.multi_reduction <add>, %234, %cst_83 [0] : vector<16x32xf32> to vector<32xf32>
      %236 = vector.shape_cast %235 : vector<32xf32> to vector<1x32xf32>
      %cst_84 = arith.constant 1.600000e+01 : f32
      %237 = vector.broadcast %cst_84 : f32 to vector<1x32xf32>
      %238 = arith.divf %236, %237 : vector<1x32xf32>
      %239 = vector.broadcast %238 : vector<1x32xf32> to vector<16x32xf32>
      %240 = arith.subf %234, %239 : vector<16x32xf32>
      %241 = arith.mulf %240, %240 : vector<16x32xf32>
      %cst_85 = arith.constant dense<0.000000e+00> : vector<32xf32>
      %242 = vector.multi_reduction <add>, %241, %cst_85 [0] : vector<16x32xf32> to vector<32xf32>
      %243 = vector.shape_cast %242 : vector<32xf32> to vector<1x32xf32>
      %cst_86 = arith.constant 1.600000e+01 : f32
      %244 = vector.broadcast %cst_86 : f32 to vector<1x32xf32>
      %245 = arith.divf %243, %244 : vector<1x32xf32>
      %cst_87 = arith.constant 9.99999974E-6 : f32
      %246 = vector.broadcast %cst_87 : f32 to vector<1x32xf32>
      %247 = arith.addf %245, %246 : vector<1x32xf32>
      %248 = math.rsqrt %247 : vector<1x32xf32>
      %249 = vector.broadcast %248 : vector<1x32xf32> to vector<16x32xf32>
      %250 = arith.mulf %240, %249 : vector<16x32xf32>
      %251 = vector.broadcast %16 : vector<16x1xf32> to vector<16x32xf32>
      %252 = arith.mulf %250, %251 : vector<16x32xf32>
      %253 = vector.broadcast %17 : vector<16x1xf32> to vector<16x32xf32>
      %254 = arith.addf %252, %253 : vector<16x32xf32>
      %cst_88 = arith.constant 0.000000e+00 : f32
      %255 = vector.broadcast %cst_88 : f32 to vector<16x32xf32>
      %256 = arith.cmpf oge, %254, %255 : vector<16x32xf32>
      %cst_89 = arith.constant 2.000000e-01 : f32
      %257 = vector.broadcast %cst_89 : f32 to vector<16x32xf32>
      %258 = arith.mulf %257, %254 : vector<16x32xf32>
      %259 = arith.select %256, %254, %258 : vector<16x32xi1>, vector<16x32xf32>
      %c128 = arith.constant 128 : index
      %c0_90 = arith.constant 0 : index
      %260 = vector.load %arg8[%c128, %c0_90] : memref<256x32xf32, #tpu.memory_space<vmem>>, vector<16x32xf32>
      tpu.vector_store %arg8[%c128, %c0_90], %259 {strides = array<i32>} : memref<256x32xf32, #tpu.memory_space<vmem>>, vector<16x32xf32>,
      %261 = vector.extract_strided_slice %15 {offsets = [144, 0], sizes = [16, 32], strides = [1, 1]} : vector<256x32xf32> to vector<16x32xf32>
      %cst_91 = arith.constant dense<0.000000e+00> : vector<32xf32>
      %262 = vector.multi_reduction <add>, %261, %cst_91 [0] : vector<16x32xf32> to vector<32xf32>
      %263 = vector.shape_cast %262 : vector<32xf32> to vector<1x32xf32>
      %cst_92 = arith.constant 1.600000e+01 : f32
      %264 = vector.broadcast %cst_92 : f32 to vector<1x32xf32>
      %265 = arith.divf %263, %264 : vector<1x32xf32>
      %266 = vector.broadcast %265 : vector<1x32xf32> to vector<16x32xf32>
      %267 = arith.subf %261, %266 : vector<16x32xf32>
      %268 = arith.mulf %267, %267 : vector<16x32xf32>
      %cst_93 = arith.constant dense<0.000000e+00> : vector<32xf32>
      %269 = vector.multi_reduction <add>, %268, %cst_93 [0] : vector<16x32xf32> to vector<32xf32>
      %270 = vector.shape_cast %269 : vector<32xf32> to vector<1x32xf32>
      %cst_94 = arith.constant 1.600000e+01 : f32
      %271 = vector.broadcast %cst_94 : f32 to vector<1x32xf32>
      %272 = arith.divf %270, %271 : vector<1x32xf32>
      %cst_95 = arith.constant 9.99999974E-6 : f32
      %273 = vector.broadcast %cst_95 : f32 to vector<1x32xf32>
      %274 = arith.addf %272, %273 : vector<1x32xf32>
      %275 = math.rsqrt %274 : vector<1x32xf32>
      %276 = vector.broadcast %275 : vector<1x32xf32> to vector<16x32xf32>
      %277 = arith.mulf %267, %276 : vector<16x32xf32>
      %278 = vector.broadcast %16 : vector<16x1xf32> to vector<16x32xf32>
      %279 = arith.mulf %277, %278 : vector<16x32xf32>
      %280 = vector.broadcast %17 : vector<16x1xf32> to vector<16x32xf32>
      %281 = arith.addf %279, %280 : vector<16x32xf32>
      %cst_96 = arith.constant 0.000000e+00 : f32
      %282 = vector.broadcast %cst_96 : f32 to vector<16x32xf32>
      %283 = arith.cmpf oge, %281, %282 : vector<16x32xf32>
      %cst_97 = arith.constant 2.000000e-01 : f32
      %284 = vector.broadcast %cst_97 : f32 to vector<16x32xf32>
      %285 = arith.mulf %284, %281 : vector<16x32xf32>
      %286 = arith.select %283, %281, %285 : vector<16x32xi1>, vector<16x32xf32>
      %c144 = arith.constant 144 : index
      %c0_98 = arith.constant 0 : index
      %287 = vector.load %arg8[%c144, %c0_98] : memref<256x32xf32, #tpu.memory_space<vmem>>, vector<16x32xf32>
      tpu.vector_store %arg8[%c144, %c0_98], %286 {strides = array<i32>} : memref<256x32xf32, #tpu.memory_space<vmem>>, vector<16x32xf32>,
      %288 = vector.extract_strided_slice %15 {offsets = [160, 0], sizes = [16, 32], strides = [1, 1]} : vector<256x32xf32> to vector<16x32xf32>
      %cst_99 = arith.constant dense<0.000000e+00> : vector<32xf32>
      %289 = vector.multi_reduction <add>, %288, %cst_99 [0] : vector<16x32xf32> to vector<32xf32>
      %290 = vector.shape_cast %289 : vector<32xf32> to vector<1x32xf32>
      %cst_100 = arith.constant 1.600000e+01 : f32
      %291 = vector.broadcast %cst_100 : f32 to vector<1x32xf32>
      %292 = arith.divf %290, %291 : vector<1x32xf32>
      %293 = vector.broadcast %292 : vector<1x32xf32> to vector<16x32xf32>
      %294 = arith.subf %288, %293 : vector<16x32xf32>
      %295 = arith.mulf %294, %294 : vector<16x32xf32>
      %cst_101 = arith.constant dense<0.000000e+00> : vector<32xf32>
      %296 = vector.multi_reduction <add>, %295, %cst_101 [0] : vector<16x32xf32> to vector<32xf32>
      %297 = vector.shape_cast %296 : vector<32xf32> to vector<1x32xf32>
      %cst_102 = arith.constant 1.600000e+01 : f32
      %298 = vector.broadcast %cst_102 : f32 to vector<1x32xf32>
      %299 = arith.divf %297, %298 : vector<1x32xf32>
      %cst_103 = arith.constant 9.99999974E-6 : f32
      %300 = vector.broadcast %cst_103 : f32 to vector<1x32xf32>
      %301 = arith.addf %299, %300 : vector<1x32xf32>
      %302 = math.rsqrt %301 : vector<1x32xf32>
      %303 = vector.broadcast %302 : vector<1x32xf32> to vector<16x32xf32>
      %304 = arith.mulf %294, %303 : vector<16x32xf32>
      %305 = vector.broadcast %16 : vector<16x1xf32> to vector<16x32xf32>
      %306 = arith.mulf %304, %305 : vector<16x32xf32>
      %307 = vector.broadcast %17 : vector<16x1xf32> to vector<16x32xf32>
      %308 = arith.addf %306, %307 : vector<16x32xf32>
      %cst_104 = arith.constant 0.000000e+00 : f32
      %309 = vector.broadcast %cst_104 : f32 to vector<16x32xf32>
      %310 = arith.cmpf oge, %308, %309 : vector<16x32xf32>
      %cst_105 = arith.constant 2.000000e-01 : f32
      %311 = vector.broadcast %cst_105 : f32 to vector<16x32xf32>
      %312 = arith.mulf %311, %308 : vector<16x32xf32>
      %313 = arith.select %310, %308, %312 : vector<16x32xi1>, vector<16x32xf32>
      %c160 = arith.constant 160 : index
      %c0_106 = arith.constant 0 : index
      %314 = vector.load %arg8[%c160, %c0_106] : memref<256x32xf32, #tpu.memory_space<vmem>>, vector<16x32xf32>
      tpu.vector_store %arg8[%c160, %c0_106], %313 {strides = array<i32>} : memref<256x32xf32, #tpu.memory_space<vmem>>, vector<16x32xf32>,
      %315 = vector.extract_strided_slice %15 {offsets = [176, 0], sizes = [16, 32], strides = [1, 1]} : vector<256x32xf32> to vector<16x32xf32>
      %cst_107 = arith.constant dense<0.000000e+00> : vector<32xf32>
      %316 = vector.multi_reduction <add>, %315, %cst_107 [0] : vector<16x32xf32> to vector<32xf32>
      %317 = vector.shape_cast %316 : vector<32xf32> to vector<1x32xf32>
      %cst_108 = arith.constant 1.600000e+01 : f32
      %318 = vector.broadcast %cst_108 : f32 to vector<1x32xf32>
      %319 = arith.divf %317, %318 : vector<1x32xf32>
      %320 = vector.broadcast %319 : vector<1x32xf32> to vector<16x32xf32>
      %321 = arith.subf %315, %320 : vector<16x32xf32>
      %322 = arith.mulf %321, %321 : vector<16x32xf32>
      %cst_109 = arith.constant dense<0.000000e+00> : vector<32xf32>
      %323 = vector.multi_reduction <add>, %322, %cst_109 [0] : vector<16x32xf32> to vector<32xf32>
      %324 = vector.shape_cast %323 : vector<32xf32> to vector<1x32xf32>
      %cst_110 = arith.constant 1.600000e+01 : f32
      %325 = vector.broadcast %cst_110 : f32 to vector<1x32xf32>
      %326 = arith.divf %324, %325 : vector<1x32xf32>
      %cst_111 = arith.constant 9.99999974E-6 : f32
      %327 = vector.broadcast %cst_111 : f32 to vector<1x32xf32>
      %328 = arith.addf %326, %327 : vector<1x32xf32>
      %329 = math.rsqrt %328 : vector<1x32xf32>
      %330 = vector.broadcast %329 : vector<1x32xf32> to vector<16x32xf32>
      %331 = arith.mulf %321, %330 : vector<16x32xf32>
      %332 = vector.broadcast %16 : vector<16x1xf32> to vector<16x32xf32>
      %333 = arith.mulf %331, %332 : vector<16x32xf32>
      %334 = vector.broadcast %17 : vector<16x1xf32> to vector<16x32xf32>
      %335 = arith.addf %333, %334 : vector<16x32xf32>
      %cst_112 = arith.constant 0.000000e+00 : f32
      %336 = vector.broadcast %cst_112 : f32 to vector<16x32xf32>
      %337 = arith.cmpf oge, %335, %336 : vector<16x32xf32>
      %cst_113 = arith.constant 2.000000e-01 : f32
      %338 = vector.broadcast %cst_113 : f32 to vector<16x32xf32>
      %339 = arith.mulf %338, %335 : vector<16x32xf32>
      %340 = arith.select %337, %335, %339 : vector<16x32xi1>, vector<16x32xf32>
      %c176 = arith.constant 176 : index
      %c0_114 = arith.constant 0 : index
      %341 = vector.load %arg8[%c176, %c0_114] : memref<256x32xf32, #tpu.memory_space<vmem>>, vector<16x32xf32>
      tpu.vector_store %arg8[%c176, %c0_114], %340 {strides = array<i32>} : memref<256x32xf32, #tpu.memory_space<vmem>>, vector<16x32xf32>,
      %342 = vector.extract_strided_slice %15 {offsets = [192, 0], sizes = [16, 32], strides = [1, 1]} : vector<256x32xf32> to vector<16x32xf32>
      %cst_115 = arith.constant dense<0.000000e+00> : vector<32xf32>
      %343 = vector.multi_reduction <add>, %342, %cst_115 [0] : vector<16x32xf32> to vector<32xf32>
      %344 = vector.shape_cast %343 : vector<32xf32> to vector<1x32xf32>
      %cst_116 = arith.constant 1.600000e+01 : f32
      %345 = vector.broadcast %cst_116 : f32 to vector<1x32xf32>
      %346 = arith.divf %344, %345 : vector<1x32xf32>
      %347 = vector.broadcast %346 : vector<1x32xf32> to vector<16x32xf32>
      %348 = arith.subf %342, %347 : vector<16x32xf32>
      %349 = arith.mulf %348, %348 : vector<16x32xf32>
      %cst_117 = arith.constant dense<0.000000e+00> : vector<32xf32>
      %350 = vector.multi_reduction <add>, %349, %cst_117 [0] : vector<16x32xf32> to vector<32xf32>
      %351 = vector.shape_cast %350 : vector<32xf32> to vector<1x32xf32>
      %cst_118 = arith.constant 1.600000e+01 : f32
      %352 = vector.broadcast %cst_118 : f32 to vector<1x32xf32>
      %353 = arith.divf %351, %352 : vector<1x32xf32>
      %cst_119 = arith.constant 9.99999974E-6 : f32
      %354 = vector.broadcast %cst_119 : f32 to vector<1x32xf32>
      %355 = arith.addf %353, %354 : vector<1x32xf32>
      %356 = math.rsqrt %355 : vector<1x32xf32>
      %357 = vector.broadcast %356 : vector<1x32xf32> to vector<16x32xf32>
      %358 = arith.mulf %348, %357 : vector<16x32xf32>
      %359 = vector.broadcast %16 : vector<16x1xf32> to vector<16x32xf32>
      %360 = arith.mulf %358, %359 : vector<16x32xf32>
      %361 = vector.broadcast %17 : vector<16x1xf32> to vector<16x32xf32>
      %362 = arith.addf %360, %361 : vector<16x32xf32>
      %cst_120 = arith.constant 0.000000e+00 : f32
      %363 = vector.broadcast %cst_120 : f32 to vector<16x32xf32>
      %364 = arith.cmpf oge, %362, %363 : vector<16x32xf32>
      %cst_121 = arith.constant 2.000000e-01 : f32
      %365 = vector.broadcast %cst_121 : f32 to vector<16x32xf32>
      %366 = arith.mulf %365, %362 : vector<16x32xf32>
      %367 = arith.select %364, %362, %366 : vector<16x32xi1>, vector<16x32xf32>
      %c192 = arith.constant 192 : index
      %c0_122 = arith.constant 0 : index
      %368 = vector.load %arg8[%c192, %c0_122] : memref<256x32xf32, #tpu.memory_space<vmem>>, vector<16x32xf32>
      tpu.vector_store %arg8[%c192, %c0_122], %367 {strides = array<i32>} : memref<256x32xf32, #tpu.memory_space<vmem>>, vector<16x32xf32>,
      %369 = vector.extract_strided_slice %15 {offsets = [208, 0], sizes = [16, 32], strides = [1, 1]} : vector<256x32xf32> to vector<16x32xf32>
      %cst_123 = arith.constant dense<0.000000e+00> : vector<32xf32>
      %370 = vector.multi_reduction <add>, %369, %cst_123 [0] : vector<16x32xf32> to vector<32xf32>
      %371 = vector.shape_cast %370 : vector<32xf32> to vector<1x32xf32>
      %cst_124 = arith.constant 1.600000e+01 : f32
      %372 = vector.broadcast %cst_124 : f32 to vector<1x32xf32>
      %373 = arith.divf %371, %372 : vector<1x32xf32>
      %374 = vector.broadcast %373 : vector<1x32xf32> to vector<16x32xf32>
      %375 = arith.subf %369, %374 : vector<16x32xf32>
      %376 = arith.mulf %375, %375 : vector<16x32xf32>
      %cst_125 = arith.constant dense<0.000000e+00> : vector<32xf32>
      %377 = vector.multi_reduction <add>, %376, %cst_125 [0] : vector<16x32xf32> to vector<32xf32>
      %378 = vector.shape_cast %377 : vector<32xf32> to vector<1x32xf32>
      %cst_126 = arith.constant 1.600000e+01 : f32
      %379 = vector.broadcast %cst_126 : f32 to vector<1x32xf32>
      %380 = arith.divf %378, %379 : vector<1x32xf32>
      %cst_127 = arith.constant 9.99999974E-6 : f32
      %381 = vector.broadcast %cst_127 : f32 to vector<1x32xf32>
      %382 = arith.addf %380, %381 : vector<1x32xf32>
      %383 = math.rsqrt %382 : vector<1x32xf32>
      %384 = vector.broadcast %383 : vector<1x32xf32> to vector<16x32xf32>
      %385 = arith.mulf %375, %384 : vector<16x32xf32>
      %386 = vector.broadcast %16 : vector<16x1xf32> to vector<16x32xf32>
      %387 = arith.mulf %385, %386 : vector<16x32xf32>
      %388 = vector.broadcast %17 : vector<16x1xf32> to vector<16x32xf32>
      %389 = arith.addf %387, %388 : vector<16x32xf32>
      %cst_128 = arith.constant 0.000000e+00 : f32
      %390 = vector.broadcast %cst_128 : f32 to vector<16x32xf32>
      %391 = arith.cmpf oge, %389, %390 : vector<16x32xf32>
      %cst_129 = arith.constant 2.000000e-01 : f32
      %392 = vector.broadcast %cst_129 : f32 to vector<16x32xf32>
      %393 = arith.mulf %392, %389 : vector<16x32xf32>
      %394 = arith.select %391, %389, %393 : vector<16x32xi1>, vector<16x32xf32>
      %c208 = arith.constant 208 : index
      %c0_130 = arith.constant 0 : index
      %395 = vector.load %arg8[%c208, %c0_130] : memref<256x32xf32, #tpu.memory_space<vmem>>, vector<16x32xf32>
      tpu.vector_store %arg8[%c208, %c0_130], %394 {strides = array<i32>} : memref<256x32xf32, #tpu.memory_space<vmem>>, vector<16x32xf32>,
      %396 = vector.extract_strided_slice %15 {offsets = [224, 0], sizes = [16, 32], strides = [1, 1]} : vector<256x32xf32> to vector<16x32xf32>
      %cst_131 = arith.constant dense<0.000000e+00> : vector<32xf32>
      %397 = vector.multi_reduction <add>, %396, %cst_131 [0] : vector<16x32xf32> to vector<32xf32>
      %398 = vector.shape_cast %397 : vector<32xf32> to vector<1x32xf32>
      %cst_132 = arith.constant 1.600000e+01 : f32
      %399 = vector.broadcast %cst_132 : f32 to vector<1x32xf32>
      %400 = arith.divf %398, %399 : vector<1x32xf32>
      %401 = vector.broadcast %400 : vector<1x32xf32> to vector<16x32xf32>
      %402 = arith.subf %396, %401 : vector<16x32xf32>
      %403 = arith.mulf %402, %402 : vector<16x32xf32>
      %cst_133 = arith.constant dense<0.000000e+00> : vector<32xf32>
      %404 = vector.multi_reduction <add>, %403, %cst_133 [0] : vector<16x32xf32> to vector<32xf32>
      %405 = vector.shape_cast %404 : vector<32xf32> to vector<1x32xf32>
      %cst_134 = arith.constant 1.600000e+01 : f32
      %406 = vector.broadcast %cst_134 : f32 to vector<1x32xf32>
      %407 = arith.divf %405, %406 : vector<1x32xf32>
      %cst_135 = arith.constant 9.99999974E-6 : f32
      %408 = vector.broadcast %cst_135 : f32 to vector<1x32xf32>
      %409 = arith.addf %407, %408 : vector<1x32xf32>
      %410 = math.rsqrt %409 : vector<1x32xf32>
      %411 = vector.broadcast %410 : vector<1x32xf32> to vector<16x32xf32>
      %412 = arith.mulf %402, %411 : vector<16x32xf32>
      %413 = vector.broadcast %16 : vector<16x1xf32> to vector<16x32xf32>
      %414 = arith.mulf %412, %413 : vector<16x32xf32>
      %415 = vector.broadcast %17 : vector<16x1xf32> to vector<16x32xf32>
      %416 = arith.addf %414, %415 : vector<16x32xf32>
      %cst_136 = arith.constant 0.000000e+00 : f32
      %417 = vector.broadcast %cst_136 : f32 to vector<16x32xf32>
      %418 = arith.cmpf oge, %416, %417 : vector<16x32xf32>
      %cst_137 = arith.constant 2.000000e-01 : f32
      %419 = vector.broadcast %cst_137 : f32 to vector<16x32xf32>
      %420 = arith.mulf %419, %416 : vector<16x32xf32>
      %421 = arith.select %418, %416, %420 : vector<16x32xi1>, vector<16x32xf32>
      %c224 = arith.constant 224 : index
      %c0_138 = arith.constant 0 : index
      %422 = vector.load %arg8[%c224, %c0_138] : memref<256x32xf32, #tpu.memory_space<vmem>>, vector<16x32xf32>
      tpu.vector_store %arg8[%c224, %c0_138], %421 {strides = array<i32>} : memref<256x32xf32, #tpu.memory_space<vmem>>, vector<16x32xf32>,
      %423 = vector.extract_strided_slice %15 {offsets = [240, 0], sizes = [16, 32], strides = [1, 1]} : vector<256x32xf32> to vector<16x32xf32>
      %cst_139 = arith.constant dense<0.000000e+00> : vector<32xf32>
      %424 = vector.multi_reduction <add>, %423, %cst_139 [0] : vector<16x32xf32> to vector<32xf32>
      %425 = vector.shape_cast %424 : vector<32xf32> to vector<1x32xf32>
      %cst_140 = arith.constant 1.600000e+01 : f32
      %426 = vector.broadcast %cst_140 : f32 to vector<1x32xf32>
      %427 = arith.divf %425, %426 : vector<1x32xf32>
      %428 = vector.broadcast %427 : vector<1x32xf32> to vector<16x32xf32>
      %429 = arith.subf %423, %428 : vector<16x32xf32>
      %430 = arith.mulf %429, %429 : vector<16x32xf32>
      %cst_141 = arith.constant dense<0.000000e+00> : vector<32xf32>
      %431 = vector.multi_reduction <add>, %430, %cst_141 [0] : vector<16x32xf32> to vector<32xf32>
      %432 = vector.shape_cast %431 : vector<32xf32> to vector<1x32xf32>
      %cst_142 = arith.constant 1.600000e+01 : f32
      %433 = vector.broadcast %cst_142 : f32 to vector<1x32xf32>
      %434 = arith.divf %432, %433 : vector<1x32xf32>
      %cst_143 = arith.constant 9.99999974E-6 : f32
      %435 = vector.broadcast %cst_143 : f32 to vector<1x32xf32>
      %436 = arith.addf %434, %435 : vector<1x32xf32>
      %437 = math.rsqrt %436 : vector<1x32xf32>
      %438 = vector.broadcast %437 : vector<1x32xf32> to vector<16x32xf32>
      %439 = arith.mulf %429, %438 : vector<16x32xf32>
      %440 = vector.broadcast %16 : vector<16x1xf32> to vector<16x32xf32>
      %441 = arith.mulf %439, %440 : vector<16x32xf32>
      %442 = vector.broadcast %17 : vector<16x1xf32> to vector<16x32xf32>
      %443 = arith.addf %441, %442 : vector<16x32xf32>
      %cst_144 = arith.constant 0.000000e+00 : f32
      %444 = vector.broadcast %cst_144 : f32 to vector<16x32xf32>
      %445 = arith.cmpf oge, %443, %444 : vector<16x32xf32>
      %cst_145 = arith.constant 2.000000e-01 : f32
      %446 = vector.broadcast %cst_145 : f32 to vector<16x32xf32>
      %447 = arith.mulf %446, %443 : vector<16x32xf32>
      %448 = arith.select %445, %443, %447 : vector<16x32xi1>, vector<16x32xf32>
      %c240 = arith.constant 240 : index
      %c0_146 = arith.constant 0 : index
      %449 = vector.load %arg8[%c240, %c0_146] : memref<256x32xf32, #tpu.memory_space<vmem>>, vector<16x32xf32>
      tpu.vector_store %arg8[%c240, %c0_146], %448 {strides = array<i32>} : memref<256x32xf32, #tpu.memory_space<vmem>>, vector<16x32xf32>,
    } else {
    }
    return
  }
  func.func @transform_0(%arg0: i32, %arg1: i32, %arg2: i32) -> (i32, i32) {
    %c0_i32 = arith.constant 0 : i32
    return %arg0, %arg2 : i32, i32
  }
  func.func @transform_1(%arg0: i32, %arg1: i32, %arg2: i32) -> (i32, i32) {
    %c0_i32 = arith.constant 0 : i32
    return %arg2, %arg1 : i32, i32
  }
  func.func @transform_2(%arg0: i32, %arg1: i32, %arg2: i32) -> (i32, i32) {
    %c0_i32 = arith.constant 0 : i32
    %c0_i32_0 = arith.constant 0 : i32
    return %c0_i32, %arg1 : i32, i32
  }
  func.func @transform_3(%arg0: i32, %arg1: i32, %arg2: i32) -> (i32, i32) {
    %c0_i32 = arith.constant 0 : i32
    %c0_i32_0 = arith.constant 0 : i32
    %c0_i32_1 = arith.constant 0 : i32
    return %c0_i32, %c0_i32_0 : i32, i32
  }
  func.func @transform_4(%arg0: i32, %arg1: i32, %arg2: i32) -> (i32, i32) {
    %c0_i32 = arith.constant 0 : i32
    %c0_i32_0 = arith.constant 0 : i32
    %c0_i32_1 = arith.constant 0 : i32
    return %c0_i32, %c0_i32_0 : i32, i32
  }
  func.func @transform_5(%arg0: i32, %arg1: i32, %arg2: i32) -> (i32, i32) {
    %c0_i32 = arith.constant 0 : i32
    return %arg0, %arg1 : i32, i32
  }
}

</mosaic_0001>

<bundles_post_ra>
// kernel: _lambda_.1
= control target key start
LH: loop header
LB: loop body
LE: loop exit
PB: predicated region body
PF: predicated region fallthrough
CT: control target
= control target key end

     0   :  { %10 = vsyncpa [#allocation4], 0  ;;  %s2871_s0 = inlined_call_operand.vmem [shape: bf16[512,36], index: 0, kind: input, shape index: {}]   ;;  %s2872_s1 = inlined_call_operand.vmem [shape: bf16[36,32], index: 1, kind: input, shape index: {}]   ;;  %s2873_s2 = inlined_call_operand.vmem [shape: f32[1,32], index: 2, kind: input, shape index: {}]   ;;  %s2874_s3 = inlined_call_operand.vmem [shape: f32[16,1], index: 3, kind: input, shape index: {}]   ;;  %s2875_s4 = inlined_call_operand.vmem [shape: f32[16,1], index: 4, kind: input, shape index: {}]   ;;  %s2876_s5 = inlined_call_operand.hbm [shape: f32[512,32], index: 5, kind: output, shape index: {}]  }
   0x1   :  { %12 = vsyncpa [#allocation4 + $0x1], 0  ;;  %s1990_s18 = smov 0   ;;  %s1992_s19 = smov 0  }
   0x2   :  { %s1994_s20 = smov 0   ;;  %s1996_s21 = smov 0  }
   0x3   :  { %s1998_s22 = smov 0   ;;  %s2000_s23 = smov 0  }
   0x4 LB: > { %s1648_s24 = sadd.s32 4294967295, %s1953_s23   ;;  %s1649_s25 = sadd.s32 4294967294, %s1953_s23   ;;  %s1953_s23 = sphi %s2000_s23, %s18_s23   ;;  %s1949_s22 = sphi %s1998_s22, %s2883_s22   ;;  %s1945_s21 = sphi %s1996_s21, %s2882_s21   ;;  %s1941_s20 = sphi %s1994_s20, %s2881_s20   ;;  %s1937_s19 = sphi %s1992_s19, %s2880_s19   ;;  %s1933_s18 = sphi %s1990_s18, %s2879_s18  }
   0x5   : > { %s37_s26 = sadd.s32 1, %s1949_s22  ;;  %s170_s27 = sadd.s32 1, %s1941_s20 }
   0x6   : > { %p39_p0 = scmp.ge.s32.totalorder %s37_s26, 2  ;;  %p180_p1 = scmp.ne.s32.totalorder %s1941_s20, %s1937_s19 }
   0x7   : > { %p181_p2 = scmp.eq.s32.totalorder %s1648_s24, 1  ;;  %p186_p3 = scmp.ne.s32.totalorder %s1937_s19, %s1933_s18 }
   0x8   : > { %s2885_s26 = smov (%p39_p0, %s37_s26), 0  ;;  %p187_p5 = scmp.eq.s32.totalorder %s1649_s25, 1 }
   0x9   : > { %p2030_p4 = por %p181_p2, %p180_p1  ;;  %s165_s29 = ssub.s32 %s1949_s22, %s2885_s26 }
   0xa   : > { %p1654_p6 = scmp.ge.s32.totalorder %s1953_s23, 1  ;;  %p168_p7 = scmp.eq.s32.totalorder %s165_s29, 0 }
   0xb   : > { %p2037_p8 = por %p187_p5, %p186_p3  ;;  %p241_p9 = scmp.lt.s32.totalorder %s1953_s23, 3 }
   0xc   : > { %s2043_s6 = scalar_select %p168_p7, %s1941_s20, %s170_s27  }
   0xd   : > { %p242_p10 = pnand %p1654_p6, %p241_p9 }
   0xe   : > { %s1656_s11 = sshll.u32 (!%p242_p10), %s1945_s21, 5  ;;  %s280_s13 = sand.u32 (!%p242_p10), 1, %s1937_s19  }
   0xf   : > { %245 = sbr.rel (%p242_p10) target bundleno = 421 (0x1a5), region = 40  ;;  %p284_p11 = scmp.lt.s32.totalorder (!%p242_p10), %s1656_s11, 63 }
  0x10   : > { %s1655_s14 = sshll.u32 (!%p242_p10), %s280_s13, 8  ;;  %s1699_s16 = sshll.u32 (!%p242_p10), %s1945_s21, 12 }
  0x11   : > { %s2636_s15 = scalar_lea.vmem (!%p242_p10), [#allocation3], %s1655_s14  ;;  %s2814_s21 = scalar_lea.hbm (!%p242_p10), %s2876_s5, %s1699_s16 }
  0x12   : > { %s1540_s17 = sshll.u32 (!%p242_p10), %s2636_s15, 4  ;;  %s2826_s27 = scalar_lea.sflag (!%p242_p10), [#allocation4], %s280_s13  ;;  %s2816_s17 = int_to_ptr.vmem [resolvable:$true] %s1540_s17 }
  0x13   : > { %s1877_s29 = scalar_lea.vmem (!%p242_p10), %s2816_s17, 4096  ;;  %s1957_s7 = smov (!%p242_p10), [#allocation3]  }
  0x14   : > { %v1826_v0 = vld [vmem:[%s2872_s1 + $0x10] ss:$0 sps:$4 sm:$0x33]   ;;  %vm556_vm0 = vcmask 1041408   ;;  %v1827_v1 = vld [vmem:[%s2872_s1 + $0x8] sm:$0xff]   ;;  %v860_v3 = vld [vmem:[%s2874_s3] sm:$0xff]  ;;  %p1878_p12 = scmp.ne.s32.totalorder %s2816_s17, %s1877_s29 }
  0x15   : > { %1763 = vmatprep.subr.msk.bf16.mxu0 %vm556_vm0, %v1826_v0  ;;  %1764 = vmatprep.subr.msk.bf16.mxu1 %vm556_vm0, %v1826_v0  ;;  %v558_v2 = vsel %vm556_vm0, %v1826_v0, 0  ;;  %v862_v4 = vld [vmem:[%s2875_s4] sm:$0xff]  ;;  %vm310_vm1 = vcmask 261120   ;;  %s2887_s11 = smov (!%p284_p11, %s1656_s11), 63  ;;  %v1955_v6 = vmov 0   ;;  %v1956_v7 = vmov 0.0  }
  0x16   : > { %1720 = vmatpush3.bf16.msra.mxu0 %v558_v2  ;;  %1760 = vmatpush3.bf16.msra.mxu1 %v558_v2  ;;  %v1828_v5 = vld [vmem:[%s2872_s1] sm:$0xff]   ;;  %313 = vst.msk [vmem:[#allocation2 + $0x10] sm:$0xff] %vm310_vm1, %v1956_v7  ;;  %311 = vst.msk [vmem:[#allocation2] sm:$0xff] %vm310_vm1, %v1956_v7  ;;  %s1657_s24 = sshll.u32 %s2887_s11, 2  ;;  %v861_v8 = vld [vmem:[%s2874_s3 + $0x8] sm:$0xff]  ;;  %vm507_vm2 = vcmask 293888   ;;  %p1879_p13 = pnand %p1878_p12, %p2030_p4 }
  0x17   : > { %1721 = vmatprep.subr.bf16.mxu0 %v1827_v1  ;;  %1758 = vmatprep.subr.bf16.mxu1 %v1827_v1  ;;  %312 = vst.msk [vmem:[#allocation2 + $0x8] sm:$0xff] %vm310_vm1, %v1956_v7  ;;  %314 = vst.msk [vmem:[#allocation2 + $0x18] sm:$0xff] %vm310_vm1, %v1956_v7  ;;  %v863_v9 = vld [vmem:[%s2875_s4 + $0x8] sm:$0xff]  ;;  %s2105_s10 = scalar_lea.vmem %s2871_s0, %s1657_s24  ;;  %v2148_v52 = vld [vmem:[%s2873_s2] ss:$0 sm:$0xff]  ;;  %s1881_s8 = sshll.u32 %s1957_s7, 4  ;;  %s1882_s8 = int_to_ptr.vmem [resolvable:$false] %s1881_s8 }
  0x18   : > { %1824 = vset.pattern.permute.xlu0 %v1955_v6  ;;  %1825 = vset.pattern.permute.xlu1 %v1955_v6  ;;  %315 = vst.msk [vmem:[#allocation2 + $0x20] sm:$0xff] %vm310_vm1, %v1956_v7  ;;  %316 = vst.msk [vmem:[#allocation2 + $0x28] sm:$0xff] %vm310_vm1, %v1956_v7  ;;  %v1829_v10 = vld [vmem:[%s2105_s10] sm:$0xff]   ;;  %v1831_v12 = vld [vmem:[%s2105_s10 + $0x8] sm:$0xff]   ;;  %p1880_p0 = pneg %p1879_p13  ;;  %s1883_s9 = scalar_lea.vmem %s1882_s8, 8192 }
  0x19   : > { %317 = vst.msk [vmem:[#allocation2 + $0x30] sm:$0xff] %vm310_vm1, %v1956_v7  ;;  %318 = vst.msk [vmem:[#allocation2 + $0x38] sm:$0xff] %vm310_vm1, %v1956_v7  ;;  %895 = vperm.xlu0 %1824, %v860_v3   ;;  %907 = vperm.xlu1 %1825, %v862_v4   ;;  %v1830_v11 = vld [vmem:[%s2105_s10 + $0x40] sm:$0xff]   ;;  %v1832_v13 = vld [vmem:[%s2105_s10 + $0x48] sm:$0xff]   ;;  %p1884_p1 = scmp.lt.s32.totalorder %s2816_s17, %s1882_s8  ;;  %p1885_p2 = scmp.lt.s32.totalorder %s1883_s9, %s1877_s29 }
  0x1a   : > { %319 = vst.msk [vmem:[#allocation2 + $0x40] sm:$0xff] %vm310_vm1, %v1956_v7  ;;  %320 = vst.msk [vmem:[#allocation2 + $0x48] sm:$0xff] %vm310_vm1, %v1956_v7  ;;  %1722 = vmatpush3.bf16.msra.mxu0 %v1827_v1  ;;  %1761 = vmatpush3.bf16.msra.mxu1 %v1827_v1  ;;  %v1833_v14 = vld [vmem:[%s2105_s10 + $0x10] sm:$0xff]   ;;  %v1835_v16 = vld [vmem:[%s2105_s10 + $0x18] sm:$0xff]  }
  0x1b   : > { %321 = vst.msk [vmem:[#allocation2 + $0x50] sm:$0xff] %vm310_vm1, %v1956_v7  ;;  %322 = vst.msk [vmem:[#allocation2 + $0x58] sm:$0xff] %vm310_vm1, %v1956_v7  ;;  %1723 = vmatprep.subr.bf16.mxu0 %v1828_v5  ;;  %1759 = vmatprep.subr.bf16.mxu1 %v1828_v5  ;;  %v1834_v15 = vld [vmem:[%s2105_s10 + $0x50] sm:$0xff]   ;;  %v1836_v17 = vld [vmem:[%s2105_s10 + $0x58] sm:$0xff]   ;;  %p1886_p3 = por %p1885_p2, %p1884_p1 }
  0x1c   : > { %323 = vst.msk [vmem:[#allocation2 + $0x60] sm:$0xff] %vm310_vm1, %v1956_v7  ;;  %324 = vst.msk [vmem:[#allocation2 + $0x68] sm:$0xff] %vm310_vm1, %v1956_v7  ;;  %1725 = vmatprep.mubr.msk.bf16.mxu0 %vm507_vm2, %v1829_v10  ;;  %1741 = vmatprep.mubr.msk.bf16.mxu1 %vm507_vm2, %v1830_v11  ;;  %v1837_v18 = vld [vmem:[%s2105_s10 + $0x20] sm:$0xff]   ;;  %v1839_v20 = vld [vmem:[%s2105_s10 + $0x28] sm:$0xff]  }
  0x1d   : > { %325 = vst.msk [vmem:[#allocation2 + $0x70] sm:$0xff] %vm310_vm1, %v1956_v7  ;;  %326 = vst.msk [vmem:[#allocation2 + $0x78] sm:$0xff] %vm310_vm1, %v1956_v7  ;;  %900 = vperm.xlu0 %1824, %v861_v8   ;;  %912 = vperm.xlu1 %1825, %v863_v9   ;;  %v1838_v19 = vld [vmem:[%s2105_s10 + $0x60] sm:$0xff]   ;;  %v1840_v21 = vld [vmem:[%s2105_s10 + $0x68] sm:$0xff]   ;;  %p1887_p5 = pnand %p1886_p3, %p1880_p0 }
  0x1e   : > { %327 = vst.msk [vmem:[#allocation2 + $0x80] sm:$0xff] %vm310_vm1, %v1956_v7  ;;  %328 = vst.msk [vmem:[#allocation2 + $0x88] sm:$0xff] %vm310_vm1, %v1956_v7  ;;  %1724 = vmatpush3.bf16.msra.mxu0 %v1828_v5  ;;  %1762 = vmatpush3.bf16.msra.mxu1 %v1828_v5  ;;  %v1841_v22 = vld [vmem:[%s2105_s10 + $0x30] sm:$0xff]   ;;  %v1843_v24 = vld [vmem:[%s2105_s10 + $0x38] sm:$0xff]  }
  0x1f   : > { %329 = vst.msk [vmem:[#allocation2 + $0x90] sm:$0xff] %vm310_vm1, %v1956_v7  ;;  %330 = vst.msk [vmem:[#allocation2 + $0x98] sm:$0xff] %vm310_vm1, %v1956_v7  ;;  %v1842_v23 = vld [vmem:[%s2105_s10 + $0x70] sm:$0xff]   ;;  %v1844_v25 = vld [vmem:[%s2105_s10 + $0x78] sm:$0xff]  }
  0x20   : > { %331 = vst.msk [vmem:[#allocation2 + $0xa0] sm:$0xff] %vm310_vm1, %v1956_v7  ;;  %332 = vst.msk [vmem:[#allocation2 + $0xa8] sm:$0xff] %vm310_vm1, %v1956_v7  ;;  %v345_v26 = vld [vmem:[#allocation2 + $0x10] sm:$0xff]  ;;  %v343_v30 = vld [vmem:[#allocation2] sm:$0xff] }
  0x21   : > { %333 = vst.msk [vmem:[#allocation2 + $0xb0] sm:$0xff] %vm310_vm1, %v1956_v7  ;;  %334 = vst.msk [vmem:[#allocation2 + $0xb8] sm:$0xff] %vm310_vm1, %v1956_v7  ;;  %1726 = vmatmul.mubr.msk.bf16.vlgmr.msra.gmra.mxu0 %vm507_vm2, %v1831_v12  ;;  %1742 = vmatmul.mubr.msk.bf16.vlgmr.msra.gmra.mxu1 %vm507_vm2, %v1832_v13  ;;  %v346_v36 = vld [vmem:[#allocation2 + $0x18] sm:$0xff]  ;;  %v344_v42 = vld [vmem:[#allocation2 + $0x8] sm:$0xff] }
  0x22   : > { %335 = vst.msk [vmem:[#allocation2 + $0xc0] sm:$0xff] %vm310_vm1, %v1956_v7  ;;  %336 = vst.msk [vmem:[#allocation2 + $0xc8] sm:$0xff] %vm310_vm1, %v1956_v7  ;;  %1729 = vmatprep.mubr.msk.bf16.mxu0 %vm507_vm2, %v1833_v14  ;;  %1745 = vmatprep.mubr.msk.bf16.mxu1 %vm507_vm2, %v1834_v15  ;;  %v349_v48 = vld [vmem:[#allocation2 + $0x30] sm:$0xff]  ;;  %v347_v55 = vld [vmem:[#allocation2 + $0x20] sm:$0xff] }
  0x23   : > { %337 = vst.msk [vmem:[#allocation2 + $0xd0] sm:$0xff] %vm310_vm1, %v1956_v7  ;;  %338 = vst.msk [vmem:[#allocation2 + $0xd8] sm:$0xff] %vm310_vm1, %v1956_v7  ;;  %v350_v3 = vld [vmem:[#allocation2 + $0x38] sm:$0xff]  ;;  %v348_v11 = vld [vmem:[#allocation2 + $0x28] sm:$0xff] }
  0x24   : > { %339 = vst.msk [vmem:[#allocation2 + $0xe0] sm:$0xff] %vm310_vm1, %v1956_v7  ;;  %340 = vst.msk [vmem:[#allocation2 + $0xe8] sm:$0xff] %vm310_vm1, %v1956_v7 }
  0x25   : > { %341 = vst.msk [vmem:[#allocation2 + $0xf0] sm:$0xff] %vm310_vm1, %v1956_v7  ;;  %342 = vst.msk [vmem:[#allocation2 + $0xf8] sm:$0xff] %vm310_vm1, %v1956_v7  ;;  %v359_v31 = vld [vmem:[#allocation2 + $0x80] sm:$0xff]  ;;  %v360_v43 = vld [vmem:[#allocation2 + $0x88] sm:$0xff] }
  0x26   : > { %v361_v27 = vld [vmem:[#allocation2 + $0x90] sm:$0xff]  ;;  %v362_v37 = vld [vmem:[#allocation2 + $0x98] sm:$0xff] }
  0x27   : > { %v363_v56 = vld [vmem:[#allocation2 + $0xa0] sm:$0xff]  ;;  %v364_v12 = vld [vmem:[#allocation2 + $0xa8] sm:$0xff] }
  0x28   : > { %v365_v49 = vld [vmem:[#allocation2 + $0xb0] sm:$0xff]  ;;  %v366_v4 = vld [vmem:[#allocation2 + $0xb8] sm:$0xff] }
  0x29   : > { %1730 = vmatmul.mubr.msk.bf16.gmra.mxu0 %vm507_vm2, %v1835_v16  ;;  %1746 = vmatmul.mubr.msk.bf16.gmra.mxu1 %vm507_vm2, %v1836_v17 }
  0x2a   : > { %1733 = vmatprep.mubr.msk.bf16.mxu0 %vm507_vm2, %v1837_v18  ;;  %1749 = vmatprep.mubr.msk.bf16.mxu1 %vm507_vm2, %v1838_v19 }
  0x31   : > { %1734 = vmatmul.mubr.msk.bf16.gmra.mxu0 %vm507_vm2, %v1839_v20  ;;  %1750 = vmatmul.mubr.msk.bf16.gmra.mxu1 %vm507_vm2, %v1840_v21 }
  0x32   : > { %1737 = vmatprep.mubr.msk.bf16.mxu0 %vm507_vm2, %v1841_v22  ;;  %1753 = vmatprep.mubr.msk.bf16.mxu1 %vm507_vm2, %v1842_v23  ;;  %v353_v23 = vld [vmem:[#allocation2 + $0x50] sm:$0xff] }
  0x39   : > { %1738 = vmatmul.mubr.msk.bf16.gmra.mxu0 %vm507_vm2, %v1843_v24  ;;  %1754 = vmatmul.mubr.msk.bf16.gmra.mxu1 %vm507_vm2, %v1844_v25  ;;  %v369_v24 = vld [vmem:[#allocation2 + $0xd0] sm:$0xff] }
  0xe1   : > { %v1727_v28 = vpop.f32.mrf.mxu0  ;;  %v1743_v29 = vpop.f32.mrf.mxu1 }
  0xe2   : > { %v723_v32 = vadd.f32 %v1727_v28, %v345_v26  ;;  %v739_v33 = vadd.f32 %v1743_v29, %v361_v27 }
  0xe3   : > { %v594_v34 = vpop.f32.mrf.mxu0  ;;  %v658_v35 = vpop.f32.mrf.mxu1 }
  0xe4   : > { %756 = vst.msk [vmem:[#allocation2 + $0x10] sm:$0xff] %vm310_vm1, %v723_v32  ;;  %772 = vst.msk [vmem:[#allocation2 + $0x90] sm:$0xff] %vm310_vm1, %v739_v33  ;;  %v721_v38 = vadd.f32 %v594_v34, %v343_v30  ;;  %v737_v39 = vadd.f32 %v658_v35, %v359_v31 }
  0xe5   : > { %v1728_v40 = vpop.f32.mrf.mxu0  ;;  %v1744_v41 = vpop.f32.mrf.mxu1 }
  0xe6   : > { %754 = vst.msk [vmem:[#allocation2] sm:$0xff] %vm310_vm1, %v721_v38  ;;  %770 = vst.msk [vmem:[#allocation2 + $0x80] sm:$0xff] %vm310_vm1, %v737_v39  ;;  %v724_v44 = vadd.f32 %v1728_v40, %v346_v36  ;;  %v740_v45 = vadd.f32 %v1744_v41, %v362_v37 }
  0xe7   : > { %v597_v46 = vpop.f32.mrf.mxu0  ;;  %v661_v47 = vpop.f32.mrf.mxu1 }
  0xe8   : > { %757 = vst.msk [vmem:[#allocation2 + $0x18] sm:$0xff] %vm310_vm1, %v724_v44  ;;  %773 = vst.msk [vmem:[#allocation2 + $0x98] sm:$0xff] %vm310_vm1, %v740_v45  ;;  %v722_v50 = vadd.f32 %v597_v46, %v344_v42  ;;  %v738_v51 = vadd.f32 %v661_v47, %v360_v43 }
  0xe9   : > { %v1731_v53 = vpop.f32.mrf.mxu0  ;;  %v1747_v54 = vpop.f32.mrf.mxu1 }
  0xea   : > { %755 = vst.msk [vmem:[#allocation2 + $0x8] sm:$0xff] %vm310_vm1, %v722_v50  ;;  %771 = vst.msk [vmem:[#allocation2 + $0x88] sm:$0xff] %vm310_vm1, %v738_v51  ;;  %v727_v57 = vadd.f32 %v1731_v53, %v349_v48  ;;  %v743_v58 = vadd.f32 %v1747_v54, %v365_v49  ;;  %v351_v49 = vld [vmem:[#allocation2 + $0x40] sm:$0xff] }
  0xeb   : > { %v791_v59 = vld [vmem:[#allocation2 + $0x10] sm:$0xff]  ;;  %v610_v61 = vpop.f32.mrf.mxu0  ;;  %v674_v62 = vpop.f32.mrf.mxu1 }
  0xec   : > { %v807_v60 = vld [vmem:[#allocation2 + $0x90] sm:$0xff]  ;;  %v2153_v63 = vadd.f32 %v2148_v52, %v791_v59  ;;  %760 = vst.msk [vmem:[#allocation2 + $0x30] sm:$0xff] %vm310_vm1, %v727_v57  ;;  %776 = vst.msk [vmem:[#allocation2 + $0xb0] sm:$0xff] %vm310_vm1, %v743_v58  ;;  %v725_v1 = vadd.f32 %v610_v61, %v347_v55  ;;  %v741_v2 = vadd.f32 %v674_v62, %v363_v56  ;;  %v367_v57 = vld [vmem:[#allocation2 + $0xc0] sm:$0xff] }
  0xed   : > { %v2156_v0 = vadd.f32 %v2148_v52, %v807_v60  ;;  %v789_v5 = vld [vmem:[#allocation2] sm:$0xff]  ;;  %v1732_v7 = vpop.f32.mrf.mxu0  ;;  %v1748_v8 = vpop.f32.mrf.mxu1 }
  0xee   : > { %v805_v6 = vld [vmem:[#allocation2 + $0x80] sm:$0xff]  ;;  %v2161_v9 = vadd.f32 %v2148_v52, %v789_v5  ;;  %758 = vst.msk [vmem:[#allocation2 + $0x20] sm:$0xff] %vm310_vm1, %v725_v1  ;;  %774 = vst.msk [vmem:[#allocation2 + $0xa0] sm:$0xff] %vm310_vm1, %v741_v2  ;;  %v728_v15 = vadd.f32 %v1732_v7, %v350_v3  ;;  %v744_v16 = vadd.f32 %v1748_v8, %v366_v4  ;;  %v925_v19 = vsel %vm310_vm1, %v2153_v63, 0.0  ;;  %v354_v4 = vld [vmem:[#allocation2 + $0x58] sm:$0xff] }
  0xef   : > { %v2164_v10 = vadd.f32 %v2148_v52, %v805_v6  ;;  %v792_v13 = vld [vmem:[#allocation2 + $0x18] sm:$0xff]  ;;  %v613_v17 = vpop.f32.mrf.mxu0  ;;  %v677_v18 = vpop.f32.mrf.mxu1  ;;  %v1245_v20 = vsel %vm310_vm1, %v2156_v0, 0.0 }
  0xf0   : > { %v808_v14 = vld [vmem:[#allocation2 + $0x98] sm:$0xff]  ;;  %v2173_v21 = vadd.f32 %v2148_v52, %v792_v13  ;;  %v864_v25 = vsel %vm310_vm1, %v2161_v9, 0.0  ;;  %761 = vst.msk [vmem:[#allocation2 + $0x38] sm:$0xff] %vm310_vm1, %v728_v15  ;;  %777 = vst.msk [vmem:[#allocation2 + $0xb8] sm:$0xff] %vm310_vm1, %v744_v16  ;;  %v726_v29 = vadd.f32 %v613_v17, %v348_v11  ;;  %v742_v30 = vadd.f32 %v677_v18, %v364_v12 }
  0xf1   : > { %v2176_v22 = vadd.f32 %v2148_v52, %v808_v14  ;;  %v1205_v26 = vsel %vm310_vm1, %v2164_v10, 0.0  ;;  %v790_v27 = vld [vmem:[#allocation2 + $0x8] sm:$0xff]  ;;  %v1735_v31 = vpop.f32.mrf.mxu0  ;;  %v1751_v32 = vpop.f32.mrf.mxu1  ;;  %v370_v6 = vld [vmem:[#allocation2 + $0xd8] sm:$0xff] }
  0xf2   : > { %v806_v28 = vld [vmem:[#allocation2 + $0x88] sm:$0xff]  ;;  %v926_v33 = vsel %vm310_vm1, %v2173_v21, 0.0  ;;  %v2189_v35 = vadd.f32 %v2148_v52, %v790_v27  ;;  %759 = vst.msk [vmem:[#allocation2 + $0x28] sm:$0xff] %vm310_vm1, %v726_v29  ;;  %775 = vst.msk [vmem:[#allocation2 + $0xa8] sm:$0xff] %vm310_vm1, %v742_v30  ;;  %v731_v41 = vadd.f32 %v1735_v31, %v353_v23  ;;  %v747_v42 = vadd.f32 %v1751_v32, %v369_v24 }
  0xf3   : > { %v1246_v34 = vsel %vm310_vm1, %v2176_v22, 0.0  ;;  %v2192_v36 = vadd.f32 %v2148_v52, %v806_v28  ;;  %v927_v37 = vadd.f32 %v926_v33, %v925_v19  ;;  %v795_v39 = vld [vmem:[#allocation2 + $0x30] sm:$0xff]  ;;  %v626_v43 = vpop.f32.mrf.mxu0  ;;  %v690_v44 = vpop.f32.mrf.mxu1 }
  0xf4   : > { %v1247_v38 = vadd.f32 %v1246_v34, %v1245_v20  ;;  %v811_v40 = vld [vmem:[#allocation2 + $0xb0] sm:$0xff]  ;;  %v865_v45 = vsel %vm310_vm1, %v2189_v35, 0.0  ;;  %v2201_v47 = vadd.f32 %v2148_v52, %v795_v39  ;;  %764 = vst.msk [vmem:[#allocation2 + $0x50] sm:$0xff] %vm310_vm1, %v731_v41  ;;  %780 = vst.msk [vmem:[#allocation2 + $0xd0] sm:$0xff] %vm310_vm1, %v747_v42  ;;  %v729_v14 = vadd.f32 %v626_v43, %v351_v49 }
  0xf5   : > { %v1206_v46 = vsel %vm310_vm1, %v2192_v36, 0.0  ;;  %v2204_v48 = vadd.f32 %v2148_v52, %v811_v40  ;;  %v928_v50 = vrot.slane %v927_v37, 4  ;;  %v866_v53 = vadd.f32 %v865_v45, %v864_v25  ;;  %v793_v55 = vld [vmem:[#allocation2 + $0x20] sm:$0xff]  ;;  %v1736_v5 = vpop.f32.mrf.mxu0  ;;  %v1752_v7 = vpop.f32.mrf.mxu1 }
  0xf6   : > { %v1248_v51 = vrot.slane %v1247_v38, 4  ;;  %v1207_v54 = vadd.f32 %v1206_v46, %v1205_v26  ;;  %v809_v56 = vld [vmem:[#allocation2 + $0xa0] sm:$0xff]  ;;  %v1005_v58 = vsel %vm310_vm1, %v2201_v47, 0.0  ;;  %v2213_v60 = vadd.f32 %v2148_v52, %v793_v55  ;;  %762 = vst.msk [vmem:[#allocation2 + $0x40] sm:$0xff] %vm310_vm1, %v729_v14 }
  0xf7   : > { %v1325_v59 = vsel %vm310_vm1, %v2204_v48, 0.0  ;;  %v2216_v61 = vadd.f32 %v2148_v52, %v809_v56  ;;  %v929_v62 = vadd.f32 %v928_v50, %v927_v37  ;;  %v867_v2 = vrot.slane %v866_v53, 4  ;;  %v796_v12 = vld [vmem:[#allocation2 + $0x38] sm:$0xff] }
  0xf8   : > { %v1249_v1 = vadd.f32 %v1248_v51, %v1247_v38  ;;  %v1208_v3 = vrot.slane %v1207_v54, 4  ;;  %v965_v8 = vsel %vm310_vm1, %v2213_v60, 0.0  ;;  %v812_v13 = vld [vmem:[#allocation2 + $0xb8] sm:$0xff]  ;;  %v745_v15 = vadd.f32 %v690_v44, %v367_v57 }
  0xf9   : > { %v1285_v11 = vsel %vm310_vm1, %v2216_v61, 0.0  ;;  %v930_v16 = vrot.slane %v929_v62, 2  ;;  %v868_v18 = vadd.f32 %v867_v2, %v866_v53  ;;  %v2223_v20 = vadd.f32 %v2148_v52, %v796_v12  ;;  %v794_v24 = vld [vmem:[#allocation2 + $0x28] sm:$0xff] }
  0xfa   : > { %v1250_v17 = vrot.slane %v1249_v1, 2  ;;  %v1209_v19 = vadd.f32 %v1208_v3, %v1207_v54  ;;  %v2226_v23 = vadd.f32 %v2148_v52, %v812_v13  ;;  %v810_v25 = vld [vmem:[#allocation2 + $0xa8] sm:$0xff]  ;;  %778 = vst.msk [vmem:[#allocation2 + $0xc0] sm:$0xff] %vm310_vm1, %v745_v15  ;;  %v732_v26 = vadd.f32 %v1736_v5, %v354_v4 }
  0xfb   : > { %v748_v27 = vadd.f32 %v1752_v7, %v370_v6  ;;  %v931_v28 = vadd.f32 %v930_v16, %v929_v62  ;;  %v869_v30 = vrot.slane %v868_v18, 2  ;;  %v1006_v32 = vsel %vm310_vm1, %v2223_v20, 0.0 }
  0xfc   : > { %v1251_v29 = vadd.f32 %v1250_v17, %v1249_v1  ;;  %v1210_v31 = vrot.slane %v1209_v19, 2  ;;  %v1326_v33 = vsel %vm310_vm1, %v2226_v23, 0.0  ;;  %v2235_v34 = vadd.f32 %v2148_v52, %v794_v24  ;;  %765 = vst.msk [vmem:[#allocation2 + $0x58] sm:$0xff] %vm310_vm1, %v732_v26 }
  0xfd   : > { %v2238_v37 = vadd.f32 %v2148_v52, %v810_v25  ;;  %781 = vst.msk [vmem:[#allocation2 + $0xd8] sm:$0xff] %vm310_vm1, %v748_v27  ;;  %v932_v38 = vrot.slane %v931_v28, 1  ;;  %v870_v40 = vadd.f32 %v869_v30, %v868_v18  ;;  %v1007_v42 = vadd.f32 %v1006_v32, %v1005_v58 }
  0xfe   : > { %v1252_v39 = vrot.slane %v1251_v29, 1  ;;  %v1211_v41 = vadd.f32 %v1210_v31, %v1209_v19  ;;  %v1327_v43 = vadd.f32 %v1326_v33, %v1325_v59  ;;  %v966_v44 = vsel %vm310_vm1, %v2235_v34, 0.0 }
  0xff   : > { %v1286_v45 = vsel %vm310_vm1, %v2238_v37, 0.0  ;;  %v933_v46 = vadd.f32 %v932_v38, %v931_v28  ;;  %v871_v50 = vrot.slane %v870_v40, 1  ;;  %v1008_v53 = vrot.slane %v1007_v42, 4 }
 0x100   : > { %v1253_v49 = vadd.f32 %v1252_v39, %v1251_v29  ;;  %v1212_v51 = vrot.slane %v1211_v41, 1  ;;  %v1328_v54 = vrot.slane %v1327_v43, 4  ;;  %v967_v55 = vadd.f32 %v966_v44, %v965_v8 }
 0x101   : > { %v1287_v56 = vadd.f32 %v1286_v45, %v1285_v11  ;;  %v934_v57 = vmul.f32 0.0625, %v933_v46  ;;  %v872_v1 = vadd.f32 %v871_v50, %v870_v40  ;;  %v1009_v58 = vadd.f32 %v1008_v53, %v1007_v42 }
 0x102   : > { %v1254_v62 = vmul.f32 0.0625, %v1253_v49  ;;  %v1213_v2 = vadd.f32 %v1212_v51, %v1211_v41  ;;  %v1329_v59 = vadd.f32 %v1328_v54, %v1327_v43  ;;  %v968_v3 = vrot.slane %v967_v55, 4 }
 0x103   : > { %v1288_v4 = vrot.slane %v1287_v56, 4  ;;  %v2247_v5 = vsub.f32 %v2153_v63, %v934_v57  ;;  %v2250_v6 = vsub.f32 %v2173_v21, %v934_v57  ;;  %v874_v11 = vmul.f32 0.0625, %v872_v1 }
 0x104   : > { %v2253_v7 = vsub.f32 %v2156_v0, %v1254_v62  ;;  %v2256_v8 = vsub.f32 %v2176_v22, %v1254_v62  ;;  %v1214_v12 = vmul.f32 0.0625, %v1213_v2  ;;  %v1010_v13 = vrot.slane %v1009_v58, 2 }
 0x105   : > { %v1330_v14 = vrot.slane %v1329_v59, 2  ;;  %v937_v15 = vmul.f32 %v2247_v5, %v2247_v5  ;;  %v938_v63 = vmul.f32 %v2250_v6, %v2250_v6  ;;  %v2267_v16 = vsub.f32 %v2161_v9, %v874_v11 }
 0x106   : > { %v1257_v21 = vmul.f32 %v2253_v7, %v2253_v7  ;;  %v1258_v0 = vmul.f32 %v2256_v8, %v2256_v8  ;;  %v2270_v22 = vsub.f32 %v2189_v35, %v874_v11  ;;  %v2273_v17 = vsub.f32 %v2164_v10, %v1214_v12 }
 0x107   : > { %v2276_v18 = vsub.f32 %v2192_v36, %v1214_v12  ;;  %v939_v19 = vsel %vm310_vm1, %v937_v15, 0.0  ;;  %v940_v24 = vsel %vm310_vm1, %v938_v63, 0.0  ;;  %v877_v35 = vmul.f32 %v2267_v16, %v2267_v16 }
 0x108   : > { %v1259_v25 = vsel %vm310_vm1, %v1257_v21, 0.0  ;;  %v1260_v26 = vsel %vm310_vm1, %v1258_v0, 0.0  ;;  %v941_v27 = vadd.f32 %v940_v24, %v939_v19  ;;  %v878_v10 = vmul.f32 %v2270_v22, %v2270_v22 }
 0x109   : > { %v1261_v9 = vadd.f32 %v1260_v26, %v1259_v25  ;;  %v1217_v36 = vmul.f32 %v2273_v17, %v2273_v17  ;;  %v1218_v28 = vmul.f32 %v2276_v18, %v2276_v18  ;;  %v1011_v29 = vadd.f32 %v1010_v13, %v1009_v58 }
 0x10a   : > { %v1331_v30 = vadd.f32 %v1330_v14, %v1329_v59  ;;  %v942_v31 = vrot.slane %v941_v27, 4  ;;  %v879_v33 = vsel %vm310_vm1, %v877_v35, 0.0  ;;  %v880_v38 = vsel %vm310_vm1, %v878_v10, 0.0 }
 0x10b   : > { %v1262_v32 = vrot.slane %v1261_v9, 4  ;;  %v881_v39 = vadd.f32 %v880_v38, %v879_v33  ;;  %v1219_v40 = vsel %vm310_vm1, %v1217_v36, 0.0  ;;  %v1220_v41 = vsel %vm310_vm1, %v1218_v28, 0.0 }
 0x10c   : > { %v1012_v42 = vrot.slane %v1011_v29, 1  ;;  %v943_v43 = vadd.f32 %v942_v31, %v941_v27  ;;  %v1221_v45 = vadd.f32 %v1220_v41, %v1219_v40  ;;  %v1332_v46 = vrot.slane %v1331_v30, 1  ;;  %v799_v40 = vld [vmem:[#allocation2 + $0x50] sm:$0xff] }
 0x10d   : > { %v1263_v44 = vadd.f32 %v1262_v32, %v1261_v9  ;;  %v882_v49 = vrot.slane %v881_v39, 4  ;;  %v969_v51 = vadd.f32 %v968_v3, %v967_v55  ;;  %v1289_v53 = vadd.f32 %v1288_v4, %v1287_v56 }
 0x10e   : > { %v1013_v50 = vadd.f32 %v1012_v42, %v1011_v29  ;;  %v944_v54 = vrot.slane %v943_v43, 2  ;;  %v1222_v62 = vrot.slane %v1221_v45, 4  ;;  %v1333_v1 = vadd.f32 %v1332_v46, %v1331_v30 }
 0x10f   : > { %v1264_v57 = vrot.slane %v1263_v44, 2  ;;  %v883_v2 = vadd.f32 %v882_v49, %v881_v39  ;;  %v970_v59 = vrot.slane %v969_v51, 2  ;;  %v1290_v11 = vrot.slane %v1289_v53, 2 }
 0x110   : > { %v1014_v58 = vmul.f32 0.0625, %v1013_v50  ;;  %v945_v12 = vadd.f32 %v944_v54, %v943_v43  ;;  %v1223_v14 = vadd.f32 %v1222_v62, %v1221_v45  ;;  %v1334_v15 = vmul.f32 0.0625, %v1333_v1 }
 0x111   : > { %v1265_v13 = vadd.f32 %v1264_v57, %v1263_v44  ;;  %v884_v63 = vrot.slane %v883_v2, 2  ;;  %v971_v55 = vadd.f32 %v970_v59, %v969_v51  ;;  %v1291_v50 = vadd.f32 %v1290_v11, %v1289_v53 }
 0x112   : > { %v2295_v21 = vsub.f32 %v2201_v47, %v1014_v58  ;;  %v2298_v0 = vsub.f32 %v2223_v20, %v1014_v58  ;;  %v946_v56 = vrot.slane %v945_v12, 1  ;;  %v1224_v4 = vrot.slane %v1223_v14, 2  ;;  %v815_v58 = vld [vmem:[#allocation2 + $0xd0] sm:$0xff] }
 0x113   : > { %v1266_v3 = vrot.slane %v1265_v13, 1  ;;  %v2301_v19 = vsub.f32 %v2204_v48, %v1334_v15  ;;  %v885_v24 = vadd.f32 %v884_v63, %v883_v2  ;;  %v2308_v47 = vsub.f32 %v2226_v23, %v1334_v15  ;;  %v797_v15 = vld [vmem:[#allocation2 + $0x40] sm:$0xff] }
 0x114   : > { %v1017_v25 = vmul.f32 %v2295_v21, %v2295_v21  ;;  %v1018_v26 = vmul.f32 %v2298_v0, %v2298_v0  ;;  %v947_v27 = vadd.f32 %v946_v56, %v945_v12  ;;  %v1225_v9 = vadd.f32 %v1224_v4, %v1223_v14  ;;  %v629_v56 = vpop.f32.mrf.mxu0 }
 0x115   : > { %v1267_v20 = vadd.f32 %v1266_v3, %v1265_v13  ;;  %v1337_v35 = vmul.f32 %v2301_v19, %v2301_v19  ;;  %v886_v10 = vrot.slane %v885_v24, 1  ;;  %v1338_v28 = vmul.f32 %v2308_v47, %v2308_v47 }
 0x116   : > { %v1019_v48 = vsel %vm310_vm1, %v1017_v25, 0.0  ;;  %v1020_v36 = vsel %vm310_vm1, %v1018_v26, 0.0  ;;  %v948_v29 = vmul.f32 0.0625, %v947_v27  ;;  %v1226_v31 = vrot.slane %v1225_v9, 1  ;;  %v693_v25 = vpop.f32.mrf.mxu1 }
 0x117   : > { %v1268_v30 = vmul.f32 0.0625, %v1267_v20  ;;  %v1021_v32 = vadd.f32 %v1020_v36, %v1019_v48  ;;  %v887_v23 = vadd.f32 %v886_v10, %v885_v24  ;;  %v1339_v33 = vsel %vm310_vm1, %v1337_v35, 0.0  ;;  %v800_v48 = vld [vmem:[#allocation2 + $0x58] sm:$0xff] }
 0x118   : > { %v1340_v38 = vsel %vm310_vm1, %v1338_v28, 0.0  ;;  %v972_v39 = vrot.slane %v971_v55, 1  ;;  %v949_v41 = vadd.f32 1e-05, %v948_v29  ;;  %v1227_v43 = vadd.f32 %v1226_v31, %v1225_v9  ;;  %v816_v36 = vld [vmem:[#allocation2 + $0xd8] sm:$0xff] }
 0x119   : > { %v1269_v42 = vadd.f32 1e-05, %v1268_v30  ;;  %v1022_v44 = vrot.slane %v1021_v32, 4  ;;  %v888_v45 = vmul.f32 0.0625, %v887_v23  ;;  %v1341_v46 = vadd.f32 %v1340_v38, %v1339_v33 }
 0x11a   : > { %v973_v49 = vadd.f32 %v972_v39, %v971_v55  ;;  %1845 = vrsqrt.f32 %v949_v41  ;;  %v1228_v51 = vmul.f32 0.0625, %v1227_v43  ;;  %v2319_v57 = vadd.f32 %v2148_v52, %v799_v40  ;;  %v813_v55 = vld [vmem:[#allocation2 + $0xc0] sm:$0xff]  ;;  %v352_v40 = vld [vmem:[#allocation2 + $0x48] sm:$0xff]  ;;  %v1755_v41 = vpop.f32.mrf.mxu1 }
 0x11b   : > { %v1023_v54 = vadd.f32 %v1022_v44, %v1021_v32  ;;  %1847 = vrsqrt.f32 %v1269_v42  ;;  %v889_v62 = vadd.f32 1e-05, %v888_v45  ;;  %v1342_v1 = vrot.slane %v1341_v46, 4  ;;  %v2350_v32 = vpop.f32.mrf.mxu0 }
 0x11c   : > { %v974_v2 = vmul.f32 0.0625, %v973_v49  ;;  %v1229_v59 = vadd.f32 1e-05, %v1228_v51  ;;  %v1292_v13 = vrot.slane %v1291_v50, 1  ;;  %v1085_v14 = vsel %vm310_vm1, %v2319_v57, 0.0 }
 0x11d   : > { %v1024_v12 = vrot.slane %v1023_v54, 2  ;;  %1849 = vrsqrt.f32 %v889_v62  ;;  %v1343_v53 = vadd.f32 %v1342_v1, %v1341_v46  ;;  %v2330_v24 = vadd.f32 %v2148_v52, %v815_v58  ;;  %v642_v1 = vpop.f32.mrf.mxu0 }
 0x11e   : > { %v2324_v11 = vsub.f32 %v2213_v60, %v974_v2  ;;  %v2327_v63 = vsub.f32 %v2235_v34, %v974_v2  ;;  %1851 = vrsqrt.f32 %v1229_v59  ;;  %v1293_v4 = vadd.f32 %v1292_v13, %v1291_v50  ;;  %v706_v13 = vpop.f32.mrf.mxu1 }
 0x11f   : > { %v1025_v3 = vadd.f32 %v1024_v12, %v1023_v54  ;;  %v1344_v26 = vrot.slane %v1343_v53, 2  ;;  %v2337_v20 = vadd.f32 %v2148_v52, %v797_v15  ;;  %v1405_v35 = vsel %vm310_vm1, %v2330_v24, 0.0 }
 0x120   : > { %v977_v27 = vmul.f32 %v2324_v11, %v2324_v11  ;;  %v978_v60 = vmul.f32 %v2327_v63, %v2327_v63  ;;  %v1294_v9 = vmul.f32 0.0625, %v1293_v4  ;;  %v2342_v10 = vadd.f32 %v2148_v52, %v813_v55 }
 0x121   : > { %v1026_v34 = vrot.slane %v1025_v3, 1  ;;  %v1345_v28 = vadd.f32 %v1344_v26, %v1343_v53  ;;  %v2348_v31 = vsel %vm310_vm1, %v2337_v20, 0.0  ;;  %v2363_v44 = vadd.f32 %v2148_v52, %v800_v48  ;;  %v368_v26 = vld [vmem:[#allocation2 + $0xc8] sm:$0xff] }
 0x122   : > { %v979_v29 = vsel %vm310_vm1, %v977_v27, 0.0  ;;  %v980_v30 = vsel %vm310_vm1, %v978_v60, 0.0  ;;  %v2353_v38 = vsub.f32 %v2216_v61, %v1294_v9  ;;  %v2356_v39 = vsub.f32 %v2238_v37, %v1294_v9 }
 0x123   : > { %v1027_v23 = vadd.f32 %v1026_v34, %v1025_v3  ;;  %v981_v33 = vadd.f32 %v980_v30, %v979_v29  ;;  %v1346_v42 = vrot.slane %v1345_v28, 1  ;;  %v2360_v43 = vsel %vm310_vm1, %v2342_v10, 0.0 }
 0x124   : > { %v2366_v45 = vadd.f32 %v2148_v52, %v816_v36  ;;  %v1297_v61 = vmul.f32 %v2353_v38, %v2353_v38  ;;  %v1298_v37 = vmul.f32 %v2356_v39, %v2356_v39  ;;  %v1086_v51 = vsel %vm310_vm1, %v2363_v44, 0.0  ;;  %v1740_v36 = vpop.f32.mrf.mxu0 }
 0x125   : > { %v1028_v46 = vmul.f32 0.0625, %v1027_v23  ;;  %v982_v49 = vrot.slane %v981_v33, 4  ;;  %v1347_v50 = vadd.f32 %v1346_v42, %v1345_v28  ;;  %v730_v62 = vadd.f32 %v629_v56, %v352_v40  ;;  %v373_v40 = vld [vmem:[#allocation2 + $0xf0] sm:$0xff] }
 0x126   : > { %v1406_v54 = vsel %vm310_vm1, %v2366_v45, 0.0  ;;  %v1299_v59 = vsel %vm310_vm1, %v1297_v61, 0.0  ;;  %v1300_v12 = vsel %vm310_vm1, %v1298_v37, 0.0  ;;  %v1087_v3 = vadd.f32 %v1086_v51, %v1085_v14  ;;  %v371_v61 = vld [vmem:[#allocation2 + $0xe0] sm:$0xff] }
 0x127   : > { %v1029_v2 = vadd.f32 1e-05, %v1028_v46  ;;  %v983_v58 = vadd.f32 %v982_v49, %v981_v33  ;;  %v1846_v15 = vpop.eup %1845  ;;  %v1348_v53 = vmul.f32 0.0625, %v1347_v50  ;;  %v1301_v55 = vadd.f32 %v1300_v12, %v1299_v59  ;;  %763 = vst.msk [vmem:[#allocation2 + $0x48] sm:$0xff] %vm310_vm1, %v730_v62  ;;  %v357_v33 = vld [vmem:[#allocation2 + $0x70] sm:$0xff]  ;;  %v355_v49 = vld [vmem:[#allocation2 + $0x60] sm:$0xff]  ;;  %v645_v12 = vpop.f32.mrf.mxu0 }
 0x128   : > { %v1407_v4 = vadd.f32 %v1406_v54, %v1405_v35  ;;  %v1848_v27 = vpop.eup %1847  ;;  %v2380_v60 = vmul.f32 %v1846_v15, %v2247_v5  ;;  %v2383_v56 = vmul.f32 %v1846_v15, %v2250_v6  ;;  %v1088_v30 = vrot.slane %v1087_v3, 4  ;;  %v1756_v6 = vpop.f32.mrf.mxu1  ;;  %v358_v54 = vld [vmem:[#allocation2 + $0x78] sm:$0xff]  ;;  %v356_v59 = vld [vmem:[#allocation2 + $0x68] sm:$0xff] }
 0x129   : > { %1853 = vrsqrt.f32 %v1029_v2  ;;  %v984_v34 = vrot.slane %v983_v58, 2  ;;  %v2386_v9 = vmul.f32 %v1848_v27, %v2253_v7  ;;  %v2389_v48 = vmul.f32 %v1848_v27, %v2256_v8 }
 0x12a   : > { %v1349_v14 = vadd.f32 1e-05, %v1348_v53  ;;  %v1302_v35 = vrot.slane %v1301_v55, 4  ;;  %v1850_v28 = vpop.eup %1849  ;;  %v1408_v23 = vrot.slane %v1407_v4, 4  ;;  %v746_v5 = vadd.f32 %v693_v25, %v368_v26  ;;  %v709_v27 = vpop.f32.mrf.mxu1 }
 0x12b   : > { %v985_v29 = vadd.f32 %v984_v34, %v983_v58  ;;  %v1852_v42 = vpop.eup %1851  ;;  %v891_v46 = vmul.f32 %v1850_v28, %v2267_v16  ;;  %v2393_v7 = vmul.f32 %v1850_v28, %v2270_v22  ;;  %v1089_v25 = vadd.f32 %v1088_v30, %v1087_v3  ;;  %v374_v58 = vld [vmem:[#allocation2 + $0xf8] sm:$0xff] }
 0x12c   : > { %1855 = vrsqrt.f32 %v1349_v14  ;;  %v1303_v8 = vadd.f32 %v1302_v35, %v1301_v55  ;;  %v1231_v37 = vmul.f32 %v1852_v42, %v2273_v17  ;;  %v2397_v50 = vmul.f32 %v1852_v42, %v2276_v18  ;;  %779 = vst.msk [vmem:[#allocation2 + $0xc8] sm:$0xff] %vm310_vm1, %v746_v5  ;;  %v372_v18 = vld [vmem:[#allocation2 + $0xe8] sm:$0xff] }
 0x12d   : > { %v986_v51 = vrot.slane %v985_v29, 1  ;;  %v1409_v2 = vadd.f32 %v1408_v23, %v1407_v4  ;;  %v735_v16 = vadd.f32 %v2350_v32, %v357_v33  ;;  %v751_v22 = vadd.f32 %v1755_v41, %v373_v40  ;;  %v2411_v23 = vpop.permute.xlu0 %895 }
 0x12e   : > { %v1304_v62 = vrot.slane %v1303_v8, 2  ;;  %v1090_v53 = vrot.slane %v1089_v25, 2  ;;  %v798_v55 = vld [vmem:[#allocation2 + $0x48] sm:$0xff]  ;;  %v733_v17 = vadd.f32 %v642_v1, %v355_v49  ;;  %v749_v26 = vadd.f32 %v706_v13, %v371_v61 }
 0x12f   : > { %v987_v15 = vadd.f32 %v986_v51, %v985_v29  ;;  %v1410_v3 = vrot.slane %v1409_v2, 2  ;;  %v2402_v14 = vadd.f32 %v2148_v52, %v798_v55  ;;  %768 = vst.msk [vmem:[#allocation2 + $0x70] sm:$0xff] %vm310_vm1, %v735_v16  ;;  %784 = vst.msk [vmem:[#allocation2 + $0xf0] sm:$0xff] %vm310_vm1, %v751_v22  ;;  %v736_v32 = vadd.f32 %v1740_v36, %v358_v54  ;;  %v2428_v54 = vpop.permute.xlu1 %907 }
 0x130   : > { %v1305_v34 = vadd.f32 %v1304_v62, %v1303_v8  ;;  %v1091_v4 = vadd.f32 %v1090_v53, %v1089_v25  ;;  %766 = vst.msk [vmem:[#allocation2 + $0x60] sm:$0xff] %vm310_vm1, %v733_v17  ;;  %782 = vst.msk [vmem:[#allocation2 + $0xe0] sm:$0xff] %vm310_vm1, %v749_v26  ;;  %v752_v1 = vadd.f32 %v1756_v6, %v374_v58 }
 0x131   : > { %v988_v41 = vmul.f32 0.0625, %v987_v15  ;;  %v734_v13 = vadd.f32 %v645_v12, %v356_v59  ;;  %v1411_v28 = vadd.f32 %v1410_v3, %v1409_v2  ;;  %v1046_v29 = vsel %vm310_vm1, %v2402_v14, 0.0  ;;  %769 = vst.msk [vmem:[#allocation2 + $0x78] sm:$0xff] %vm310_vm1, %v736_v32 }
 0x132   : > { %v1306_v35 = vrot.slane %v1305_v34, 1  ;;  %v750_v30 = vadd.f32 %v709_v27, %v372_v18  ;;  %v1092_v36 = vrot.slane %v1091_v4, 1  ;;  %v1047_v33 = vadd.f32 %v1046_v29, %v2348_v31  ;;  %785 = vst.msk [vmem:[#allocation2 + $0xf8] sm:$0xff] %vm310_vm1, %v752_v1 }
 0x133   : > { %v989_v5 = vadd.f32 1e-05, %v988_v41  ;;  %767 = vst.msk [vmem:[#allocation2 + $0x68] sm:$0xff] %vm310_vm1, %v734_v13  ;;  %v903_v40 = vmul.f32 %v2411_v23, %v891_v46  ;;  %v1412_v42 = vrot.slane %v1411_v28, 1  ;;  %v814_v8 = vld [vmem:[#allocation2 + $0xc8] sm:$0xff]  ;;  %v2420_v49 = vmul.f32 %v2380_v60, %v2411_v23 }
 0x134   : > { %v1307_v6 = vadd.f32 %v1306_v35, %v1305_v34  ;;  %783 = vst.msk [vmem:[#allocation2 + $0xe8] sm:$0xff] %vm310_vm1, %v750_v30  ;;  %v2423_v61 = vmul.f32 %v1231_v37, %v2411_v23  ;;  %v1093_v31 = vadd.f32 %v1092_v36, %v1091_v4  ;;  %v1048_v51 = vrot.slane %v1047_v33, 4 }
 0x135   : > { %1857 = vrsqrt.f32 %v989_v5  ;;  %v2426_v25 = vadd.f32 %v2148_v52, %v814_v8  ;;  %v1413_v2 = vadd.f32 %v1412_v42, %v1411_v28  ;;  %v2432_v16 = vmul.f32 %v2386_v9, %v2411_v23 }
 0x136   : > { %v1854_v46 = vpop.eup %1853  ;;  %v1308_v62 = vmul.f32 0.0625, %v1307_v6  ;;  %v2435_v60 = vadd.f32 %v2428_v54, %v903_v40  ;;  %v1094_v58 = vmul.f32 0.0625, %v1093_v31  ;;  %v1049_v59 = vadd.f32 %v1048_v51, %v1047_v33  ;;  %v803_v12 = vld [vmem:[#allocation2 + $0x70] sm:$0xff] }
 0x137   : > { %v2438_v37 = vmul.f32 %v1854_v46, %v2295_v21  ;;  %v2441_v22 = vmul.f32 %v1854_v46, %v2298_v0  ;;  %v1414_v53 = vmul.f32 0.0625, %v1413_v2  ;;  %v1366_v55 = vsel %vm310_vm1, %v2426_v25, 0.0  ;;  %v819_v27 = vld [vmem:[#allocation2 + $0xf0] sm:$0xff]  ;;  %v801_v1 = vld [vmem:[#allocation2 + $0x60] sm:$0xff] }
 0x138   : > { %v1309_v15 = vadd.f32 1e-05, %v1308_v62  ;;  %v2446_v9 = vadd.f32 %v2148_v52, %v803_v12  ;;  %v2449_v26 = vsub.f32 %v2319_v57, %v1094_v58  ;;  %v2452_v21 = vsub.f32 %v2363_v44, %v1094_v58  ;;  %v817_v13 = vld [vmem:[#allocation2 + $0xe0] sm:$0xff]  ;;  %v804_v30 = vld [vmem:[#allocation2 + $0x78] sm:$0xff] }
 0x139   : > { %v1856_v17 = vpop.eup %1855  ;;  %v1050_v0 = vrot.slane %v1049_v59, 2  ;;  %v1367_v18 = vadd.f32 %v1366_v55, %v2360_v43  ;;  %v2462_v32 = vsub.f32 %v2330_v24, %v1414_v53  ;;  %v2469_v41 = vsub.f32 %v2366_v45, %v1414_v53  ;;  %v820_v6 = vld [vmem:[#allocation2 + $0xf8] sm:$0xff] }
 0x13a   : > { %v2456_v34 = vmul.f32 %v1856_v17, %v2301_v19  ;;  %v2459_v3 = vmul.f32 %v1856_v17, %v2308_v47  ;;  %1859 = vrsqrt.f32 %v1309_v15  ;;  %v1097_v57 = vmul.f32 %v2449_v26, %v2449_v26 }
 0x13b   : > { %v1098_v44 = vmul.f32 %v2452_v21, %v2452_v21  ;;  %v1051_v43 = vadd.f32 %v1050_v0, %v1049_v59  ;;  %v1417_v19 = vmul.f32 %v2462_v32, %v2462_v32  ;;  %v1368_v4 = vrot.slane %v1367_v18, 4 }
 0x13c   : > { %v1165_v47 = vsel %vm310_vm1, %v2446_v9, 0.0  ;;  %v2476_v24 = vadd.f32 %v2148_v52, %v819_v27  ;;  %v1099_v35 = vsel %vm310_vm1, %v1097_v57, 0.0  ;;  %v1418_v45 = vmul.f32 %v2469_v41, %v2469_v41  ;;  %v802_v57 = vld [vmem:[#allocation2 + $0x68] sm:$0xff] }
 0x13d   : > { %v1100_v28 = vsel %vm310_vm1, %v1098_v44, 0.0  ;;  %v1052_v29 = vrot.slane %v1051_v43, 1  ;;  %v1419_v36 = vsel %vm310_vm1, %v1417_v19, 0.0  ;;  %v1369_v33 = vadd.f32 %v1368_v4, %v1367_v18 }
 0x13e   : > { %v1101_v5 = vadd.f32 %v1100_v28, %v1099_v35  ;;  %v1485_v40 = vsel %vm310_vm1, %v2476_v24, 0.0  ;;  %v1420_v42 = vsel %vm310_vm1, %v1418_v45, 0.0  ;;  %v2487_v31 = vadd.f32 %v2148_v52, %v801_v1 }
 0x13f   : > { %v1053_v8 = vadd.f32 %v1052_v29, %v1051_v43  ;;  %v2490_v51 = vadd.f32 %v2148_v52, %v817_v13  ;;  %v1421_v62 = vadd.f32 %v1420_v42, %v1419_v36  ;;  %v1370_v2 = vrot.slane %v1369_v33, 2 }
 0x140   : > { %v1102_v46 = vrot.slane %v1101_v5, 4  ;;  %v2493_v58 = vadd.f32 %v2148_v52, %v804_v30  ;;  %v1125_v12 = vsel %vm310_vm1, %v2487_v31, 0.0  ;;  %v2502_v53 = vadd.f32 %v2148_v52, %v820_v6 }
 0x141   : > { %v1054_v59 = vmul.f32 0.0625, %v1053_v8  ;;  %v2499_v15 = vsel %vm310_vm1, %v2490_v51, 0.0  ;;  %v1422_v0 = vrot.slane %v1421_v62, 4  ;;  %v1371_v18 = vadd.f32 %v1370_v2, %v1369_v33  ;;  %v818_v8 = vld [vmem:[#allocation2 + $0xe8] sm:$0xff] }
 0x142   : > { %v1858_v55 = vpop.eup %1857  ;;  %v1103_v17 = vadd.f32 %v1102_v46, %v1101_v5  ;;  %v1166_v27 = vsel %vm310_vm1, %v2493_v58, 0.0  ;;  %v2525_v29 = vadd.f32 %v2148_v52, %v802_v57  ;;  %vm917_vm3 = vcmp.ge.f32.partialorder %v2435_v60, 0.0 }
 0x143   : > { %v2507_v44 = vmul.f32 %v1858_v55, %v2324_v11  ;;  %v2510_v43 = vmul.f32 %v1858_v55, %v2327_v63  ;;  %v2513_v19 = vsub.f32 %v2337_v20, %v1054_v59  ;;  %v2516_v4 = vsub.f32 %v2402_v14, %v1054_v59 }
 0x144   : > { %v1104_v1 = vrot.slane %v1103_v17, 2  ;;  %v1423_v13 = vadd.f32 %v1422_v0, %v1421_v62  ;;  %v1372_v35 = vrot.slane %v1371_v18, 1  ;;  %v1167_v28 = vadd.f32 %v1166_v27, %v1165_v47 }
 0x145   : > { %v1057_v45 = vmul.f32 %v2513_v19, %v2513_v19  ;;  %v1058_v11 = vmul.f32 %v2516_v4, %v2516_v4  ;;  %v1486_v63 = vsel %vm310_vm1, %v2502_v53, 0.0  ;;  %v1126_v42 = vsel %vm310_vm1, %v2525_v29, 0.0 }
 0x146   : > { %v1105_v20 = vadd.f32 %v1104_v1, %v1103_v17  ;;  %v1424_v30 = vrot.slane %v1423_v13, 2  ;;  %v1373_v14 = vadd.f32 %v1372_v35, %v1371_v18  ;;  %v1168_v5 = vrot.slane %v1167_v28, 4 }
 0x147   : > { %v1860_v36 = vpop.eup %1859  ;;  %v1059_v33 = vsel %vm310_vm1, %v1057_v45, 0.0  ;;  %v1060_v47 = vsel %vm310_vm1, %v1058_v11, 0.0  ;;  %v1487_v6 = vadd.f32 %v1486_v63, %v1485_v40  ;;  %v1127_v1 = vadd.f32 %v1126_v42, %v1125_v12 }
 0x148   : > { %v1311_v46 = vmul.f32 %v1860_v36, %v2353_v38  ;;  %v2533_v62 = vmul.f32 %v1860_v36, %v2356_v39  ;;  %v1106_v2 = vrot.slane %v1105_v20, 1  ;;  %v1425_v59 = vadd.f32 %v1424_v30, %v1423_v13 }
 0x149   : > { %v1061_v55 = vadd.f32 %v1060_v47, %v1059_v33  ;;  %v1374_v17 = vmul.f32 0.0625, %v1373_v14  ;;  %v1169_v0 = vadd.f32 %v1168_v5, %v1167_v28  ;;  %v1488_v18 = vrot.slane %v1487_v6, 4 }
 0x14a   : > { %v1107_v27 = vadd.f32 %v1106_v2, %v1105_v20  ;;  %v1426_v57 = vrot.slane %v1425_v59, 1  ;;  %v2536_v40 = vadd.f32 %v2148_v52, %v818_v8  ;;  %v1128_v30 = vrot.slane %v1127_v1, 4 }
 0x14b   : > { %v1062_v35 = vrot.slane %v1061_v55, 4  ;;  %v2539_v45 = vsub.f32 %v2342_v10, %v1374_v17  ;;  %v2542_v38 = vsub.f32 %v2426_v25, %v1374_v17  ;;  %v1170_v39 = vrot.slane %v1169_v0, 2 }
 0x14c   : > { %v1108_v11 = vmul.f32 0.0625, %v1107_v27  ;;  %v1427_v13 = vadd.f32 %v1426_v57, %v1425_v59  ;;  %v1489_v63 = vadd.f32 %v1488_v18, %v1487_v6  ;;  %v1129_v36 = vadd.f32 %v1128_v30, %v1127_v1 }
 0x14d   : > { %v1063_v28 = vadd.f32 %v1062_v35, %v1061_v55  ;;  %v1377_v20 = vmul.f32 %v2539_v45, %v2539_v45  ;;  %v1378_v52 = vmul.f32 %v2542_v38, %v2542_v38  ;;  %v1171_v12 = vadd.f32 %v1170_v39, %v1169_v0 }
 0x14e   : > { %v1109_v14 = vadd.f32 1e-05, %v1108_v11  ;;  %v1428_v5 = vmul.f32 0.0625, %v1427_v13  ;;  %v1490_v10 = vrot.slane %v1489_v63, 2  ;;  %v1130_v17 = vrot.slane %v1129_v36, 2 }
 0x14f   : > { %v1064_v33 = vrot.slane %v1063_v28, 2  ;;  %v1379_v25 = vsel %vm310_vm1, %v1377_v20, 0.0  ;;  %v1380_v47 = vsel %vm310_vm1, %v1378_v52, 0.0  ;;  %v1172_v42 = vrot.slane %v1171_v12, 1 }
 0x150   : > { %1861 = vrsqrt.f32 %v1109_v14  ;;  %v1429_v6 = vadd.f32 1e-05, %v1428_v5  ;;  %v1381_v8 = vadd.f32 %v1380_v47, %v1379_v25  ;;  %v1491_v2 = vadd.f32 %v1490_v10, %v1489_v63 }
 0x151   : > { %v1065_v59 = vadd.f32 %v1064_v33, %v1063_v28  ;;  %v1173_v55 = vadd.f32 %v1172_v42, %v1171_v12  ;;  %v1446_v0 = vsel %vm310_vm1, %v2536_v40, 0.0  ;;  %v1131_v39 = vadd.f32 %v1130_v17, %v1129_v36 }
 0x152   : > { %1863 = vrsqrt.f32 %v1429_v6  ;;  %v1382_v18 = vrot.slane %v1381_v8, 4  ;;  %v1492_v27 = vrot.slane %v1491_v2, 1  ;;  %v1447_v57 = vadd.f32 %v1446_v0, %v2499_v15 }
 0x153   : > { %v1066_v1 = vrot.slane %v1065_v59, 1  ;;  %v1174_v35 = vmul.f32 0.0625, %v1173_v55  ;;  %v2555_v11 = vmul.f32 %v2507_v44, %v2411_v23  ;;  %v2559_v28 = vmul.f32 %v2438_v37, %v2411_v23 }
 0x154   : > { %v1383_v13 = vadd.f32 %v1382_v18, %v1381_v8  ;;  %v1493_v63 = vadd.f32 %v1492_v27, %v1491_v2  ;;  %v1448_v30 = vrot.slane %v1447_v57, 4  ;;  %v1132_v12 = vrot.slane %v1131_v39, 1 }
 0x155   : > { %v1067_v20 = vadd.f32 %v1066_v1, %v1065_v59  ;;  %v2562_v52 = vsub.f32 %v2446_v9, %v1174_v35  ;;  %v2565_v15 = vsub.f32 %v2493_v58, %v1174_v35  ;;  %v2568_v44 = vmul.f32 %v1311_v46, %v2411_v23 }
 0x156   : > { %v1384_v14 = vrot.slane %v1383_v13, 2  ;;  %v1494_v5 = vmul.f32 0.0625, %v1493_v63  ;;  %v1449_v10 = vadd.f32 %v1448_v30, %v1447_v57  ;;  %v1133_v25 = vadd.f32 %v1132_v12, %v1131_v39 }
 0x157   : > { %v1068_v36 = vmul.f32 0.0625, %v1067_v20  ;;  %v1177_v33 = vmul.f32 %v2562_v52, %v2562_v52  ;;  %v1178_v37 = vmul.f32 %v2565_v15, %v2565_v15 }
 0x158   : > { %v1385_v9 = vadd.f32 %v1384_v14, %v1383_v13  ;;  %v2575_v47 = vsub.f32 %v2476_v24, %v1494_v5  ;;  %v2578_v58 = vsub.f32 %v2502_v53, %v1494_v5  ;;  %v1450_v42 = vrot.slane %v1449_v10, 2 }
 0x159   : > { %v1069_v6 = vadd.f32 1e-05, %v1068_v36  ;;  %v1179_v46 = vsel %vm310_vm1, %v1177_v33, 0.0  ;;  %v1180_v8 = vsel %vm310_vm1, %v1178_v37, 0.0  ;;  %v1134_v2 = vmul.f32 0.0625, %v1133_v25 }
 0x15a   : > { %v1386_v59 = vrot.slane %v1385_v9, 1  ;;  %v1181_v55 = vadd.f32 %v1180_v8, %v1179_v46  ;;  %v1497_v17 = vmul.f32 %v2575_v47, %v2575_v47  ;;  %v1498_v0 = vmul.f32 %v2578_v58, %v2578_v58 }
 0x15b   : > { %1865 = vrsqrt.f32 %v1069_v6  ;;  %v2587_v24 = vsub.f32 %v2487_v31, %v1134_v2  ;;  %v2590_v53 = vsub.f32 %v2525_v29, %v1134_v2  ;;  %v1451_v18 = vadd.f32 %v1450_v42, %v1449_v10 }
 0x15c   : > { %v1387_v27 = vadd.f32 %v1386_v59, %v1385_v9  ;;  %v1182_v57 = vrot.slane %v1181_v55, 4  ;;  %v1499_v1 = vsel %vm310_vm1, %v1497_v17, 0.0  ;;  %v1500_v35 = vsel %vm310_vm1, %v1498_v0, 0.0 }
 0x15d   : > { %v1862_v39 = vpop.eup %1861  ;;  %v1501_v13 = vadd.f32 %v1500_v35, %v1499_v1  ;;  %v1137_v63 = vmul.f32 %v2587_v24, %v2587_v24  ;;  %v1138_v31 = vmul.f32 %v2590_v53, %v2590_v53  ;;  %v1452_v30 = vrot.slane %v1451_v18, 1 }
 0x15e   : > { %v1111_v29 = vmul.f32 %v1862_v39, %v2449_v26  ;;  %v2600_v20 = vmul.f32 %v1862_v39, %v2452_v21  ;;  %v1388_v12 = vmul.f32 0.0625, %v1387_v27  ;;  %v1183_v14 = vadd.f32 %v1182_v57, %v1181_v55 }
 0x15f   : > { %v1864_v5 = vpop.eup %1863  ;;  %v1502_v10 = vrot.slane %v1501_v13, 4  ;;  %v1139_v36 = vsel %vm310_vm1, %v1137_v63, 0.0  ;;  %v1140_v33 = vsel %vm310_vm1, %v1138_v31, 0.0  ;;  %v1453_v37 = vadd.f32 %v1452_v30, %v1451_v18 }
 0x160   : > { %v1431_v25 = vmul.f32 %v1864_v5, %v2462_v32  ;;  %v2606_v9 = vmul.f32 %v1864_v5, %v2469_v41  ;;  %v1389_v42 = vadd.f32 1e-05, %v1388_v12  ;;  %v1184_v26 = vrot.slane %v1183_v14, 2 }
 0x161   : > { %v1503_v21 = vadd.f32 %v1502_v10, %v1501_v13  ;;  %v1141_v6 = vadd.f32 %v1140_v33, %v1139_v36  ;;  %v1454_v46 = vmul.f32 0.0625, %v1453_v37  ;;  %v1113_v8 = vmul.f32 %v1111_v29, %v2411_v23 }
 0x162   : > { %1867 = vrsqrt.f32 %v1389_v42  ;;  %v1185_v2 = vadd.f32 %v1184_v26, %v1183_v14  ;;  %v2612_v59 = vmul.f32 %v2456_v34, %v2411_v23  ;;  %v2615_v32 = vmul.f32 %v1431_v25, %v2411_v23 }
 0x163   : > { %v1504_v41 = vrot.slane %v1503_v21, 2  ;;  %v1142_v55 = vrot.slane %v1141_v6, 4  ;;  %v2618_v17 = vsub.f32 %v2490_v51, %v1454_v46  ;;  %v2621_v0 = vsub.f32 %v2536_v40, %v1454_v46 }
 0x164   : > { %v1186_v18 = vrot.slane %v1185_v2, 1  ;;  %v919_v27 = vmul.f32 0.2, %v2435_v60  ;;  %v955_v34 = vadd.f32 %v2420_v49, %v2428_v54 }
 0x165   : > { %v1505_v57 = vadd.f32 %v1504_v41, %v1503_v21  ;;  %v1143_v1 = vadd.f32 %v1142_v55, %v1141_v6  ;;  %v1457_v35 = vmul.f32 %v2618_v17, %v2618_v17  ;;  %v1458_v51 = vmul.f32 %v2621_v0, %v2621_v0 }
 0x166   : > { %v1187_v40 = vadd.f32 %v1186_v18, %v1185_v2  ;;  %v921_v39 = vsel %vm917_vm3, %v2435_v60, %v919_v27  ;;  %vm957_vm4 = vcmp.ge.f32.partialorder %v955_v34, 0.0  ;;  %v959_v13 = vmul.f32 0.2, %v955_v34 }
 0x167   : > { %v1506_v63 = vrot.slane %v1505_v57, 1  ;;  %v1144_v31 = vrot.slane %v1143_v1, 2  ;;  %v1459_v30 = vsel %vm310_vm1, %v1457_v35, 0.0  ;;  %v1460_v29 = vsel %vm310_vm1, %v1458_v51, 0.0  ;;  %923 = vst.msk [vmem:[%s2636_s15] sm:$0xff] %vm310_vm1, %v921_v39 }
 0x168   : > { %v1866_v49 = vpop.eup %1865  ;;  %v1188_v12 = vmul.f32 0.0625, %v1187_v40  ;;  %v1461_v14 = vadd.f32 %v1460_v29, %v1459_v30  ;;  %v961_v5 = vsel %vm957_vm4, %v955_v34, %v959_v13  ;;  %v995_v60 = vadd.f32 %v2555_v11, %v2428_v54 }
 0x169   : > { %v1071_v10 = vmul.f32 %v1866_v49, %v2513_v19  ;;  %v2644_v36 = vmul.f32 %v1866_v49, %v2516_v4  ;;  %v1507_v33 = vadd.f32 %v1506_v63, %v1505_v57  ;;  %v1145_v37 = vadd.f32 %v1144_v31, %v1143_v1  ;;  %963 = vst.msk [vmem:[%s2636_s15 + $0x10] sm:$0xff] %vm310_vm1, %v961_v5 }
 0x16a   : > { %v1189_v25 = vadd.f32 1e-05, %v1188_v12  ;;  %v1462_v42 = vrot.slane %v1461_v14, 4  ;;  %vm997_vm5 = vcmp.ge.f32.partialorder %v995_v60, 0.0  ;;  %v999_v26 = vmul.f32 0.2, %v995_v60 }
 0x16b   : > { %v1508_v21 = vmul.f32 0.0625, %v1507_v33  ;;  %v1146_v6 = vrot.slane %v1145_v37, 1  ;;  %v1073_v46 = vmul.f32 %v1071_v10, %v2411_v23  ;;  %v1035_v11 = vadd.f32 %v2559_v28, %v2428_v54  ;;  %v2674_v10 = vpop.permute.xlu0 %900 }
 0x16c   : > { %1869 = vrsqrt.f32 %v1189_v25  ;;  %v1463_v19 = vadd.f32 %v1462_v42, %v1461_v14  ;;  %v1001_v4 = vsel %vm997_vm5, %v995_v60, %v999_v26  ;;  %v1115_v2 = vadd.f32 %v1113_v8, %v2428_v54 }
 0x16d   : > { %v1509_v41 = vadd.f32 1e-05, %v1508_v21  ;;  %v1147_v55 = vadd.f32 %v1146_v6, %v1145_v37  ;;  %1003 = vst.msk [vmem:[%s2636_s15 + $0x20] sm:$0xff] %vm310_vm1, %v1001_v4  ;;  %vm1037_vm6 = vcmp.ge.f32.partialorder %v1035_v11, 0.0  ;;  %v1039_v18 = vmul.f32 0.2, %v1035_v11 }
 0x16e   : > { %v1464_v27 = vrot.slane %v1463_v19, 2  ;;  %v1075_v34 = vadd.f32 %v1073_v46, %v2428_v54  ;;  %vm1117_vm7 = vcmp.ge.f32.partialorder %v1115_v2, 0.0  ;;  %v1119_v57 = vmul.f32 0.2, %v1115_v2 }
 0x16f   : > { %v1868_v1 = vpop.eup %1867  ;;  %1871 = vrsqrt.f32 %v1509_v41  ;;  %v1148_v28 = vmul.f32 0.0625, %v1147_v55  ;;  %v1041_v35 = vsel %vm1037_vm6, %v1035_v11, %v1039_v18  ;;  %v1235_v8 = vadd.f32 %v2423_v61, %v2428_v54 }
 0x170   : > { %v1391_v51 = vmul.f32 %v1868_v1, %v2539_v45  ;;  %v2659_v40 = vmul.f32 %v1868_v1, %v2542_v38  ;;  %v1465_v39 = vadd.f32 %v1464_v27, %v1463_v19  ;;  %1043 = vst.msk [vmem:[%s2636_s15 + $0x30] sm:$0xff] %vm310_vm1, %v1041_v35  ;;  %vm1077_vm8 = vcmp.ge.f32.partialorder %v1075_v34, 0.0 }
 0x171   : > { %v1149_v13 = vadd.f32 1e-05, %v1148_v28  ;;  %v1079_v63 = vmul.f32 0.2, %v1075_v34  ;;  %v1121_v31 = vsel %vm1117_vm7, %v1115_v2, %v1119_v57  ;;  %vm1237_vm9 = vcmp.ge.f32.partialorder %v1235_v8, 0.0 }
 0x172   : > { %v1466_v30 = vrot.slane %v1465_v39, 1  ;;  %v1393_v29 = vmul.f32 %v1391_v51, %v2411_v23  ;;  %1123 = vst.msk [vmem:[%s2636_s15 + $0x50] sm:$0xff] %vm310_vm1, %v1121_v31  ;;  %v1239_v61 = vmul.f32 0.2, %v1235_v8  ;;  %v1275_v45 = vadd.f32 %v2432_v16, %v2428_v54 }
 0x173   : > { %1873 = vrsqrt.f32 %v1149_v13  ;;  %v1081_v38 = vsel %vm1077_vm8, %v1075_v34, %v1079_v63  ;;  %v1315_v49 = vadd.f32 %v2568_v44, %v2428_v54  ;;  %v1355_v12 = vadd.f32 %v2612_v59, %v2428_v54 }
 0x174   : > { %v1467_v14 = vadd.f32 %v1466_v30, %v1465_v39  ;;  %1083 = vst.msk [vmem:[%s2636_s15 + $0x40] sm:$0xff] %vm310_vm1, %v1081_v38  ;;  %v1241_v5 = vsel %vm1237_vm9, %v1235_v8, %v1239_v61  ;;  %vm1277_vm10 = vcmp.ge.f32.partialorder %v1275_v45, 0.0  ;;  %v1279_v60 = vmul.f32 0.2, %v1275_v45 }
 0x175   : > { %1243 = vst.msk [vmem:[%s2636_s15 + $0x80] sm:$0xff] %vm310_vm1, %v1241_v5  ;;  %vm1317_vm11 = vcmp.ge.f32.partialorder %v1315_v49, 0.0  ;;  %v1319_v16 = vmul.f32 0.2, %v1315_v49  ;;  %vm1357_vm12 = vcmp.ge.f32.partialorder %v1355_v12, 0.0  ;;  %v1395_v59 = vadd.f32 %v1393_v29, %v2428_v54 }
 0x176   : > { %v1359_v44 = vmul.f32 0.2, %v1355_v12  ;;  %v1468_v33 = vmul.f32 0.0625, %v1467_v14  ;;  %v1281_v37 = vsel %vm1277_vm10, %v1275_v45, %v1279_v60  ;;  %v1435_v25 = vadd.f32 %v2615_v32, %v2428_v54 }
 0x177   : > { %1283 = vst.msk [vmem:[%s2636_s15 + $0x90] sm:$0xff] %vm310_vm1, %v1281_v37  ;;  %v1321_v42 = vsel %vm1317_vm11, %v1315_v49, %v1319_v16  ;;  %v904_v21 = vmul.f32 %v2674_v10, %v2393_v7  ;;  %v954_v6 = vmul.f32 %v2383_v56, %v2674_v10  ;;  %vm1397_vm13 = vcmp.ge.f32.partialorder %v1395_v59, 0.0 }
 0x178   : > { %v1361_v26 = vsel %vm1357_vm12, %v1355_v12, %v1359_v44  ;;  %v1469_v46 = vadd.f32 1e-05, %v1468_v33  ;;  %1323 = vst.msk [vmem:[%s2636_s15 + $0xa0] sm:$0xff] %vm310_vm1, %v1321_v42  ;;  %v1399_v11 = vmul.f32 0.2, %v1395_v59  ;;  %vm1437_vm14 = vcmp.ge.f32.partialorder %v1435_v25, 0.0 }
 0x179   : > { %1363 = vst.msk [vmem:[%s2636_s15 + $0xb0] sm:$0xff] %vm310_vm1, %v1361_v26  ;;  %v1870_v32 = vpop.eup %1869  ;;  %v1439_v19 = vmul.f32 0.2, %v1435_v25  ;;  %v994_v4 = vmul.f32 %v2510_v43, %v2674_v10  ;;  %v1034_v7 = vmul.f32 %v2441_v22, %v2674_v10  ;;  %v1074_v56 = vmul.f32 %v2644_v36, %v2674_v10  ;;  %v2711_v36 = vpop.permute.xlu1 %912 }
 0x17a   : > { %v1191_v2 = vmul.f32 %v1870_v32, %v2562_v52  ;;  %v1192_v41 = vmul.f32 %v1870_v32, %v2565_v15  ;;  %1875 = vrsqrt.f32 %v1469_v46  ;;  %v1401_v55 = vsel %vm1397_vm13, %v1395_v59, %v1399_v11 }
 0x17b   : > { %1403 = vst.msk [vmem:[%s2636_s15 + $0xc0] sm:$0xff] %vm310_vm1, %v1401_v55  ;;  %v1441_v18 = vsel %vm1437_vm14, %v1435_v25, %v1439_v19  ;;  %v1114_v27 = vmul.f32 %v2600_v20, %v2674_v10  ;;  %v2705_v43 = vmul.f32 %v2397_v50, %v2674_v10  ;;  %v2709_v22 = vmul.f32 %v2389_v48, %v2674_v10 }
 0x17c   : > { %v1872_v52 = vpop.eup %1871  ;;  %v1193_v15 = vmul.f32 %v1191_v2, %v2411_v23  ;;  %1443 = vst.msk [vmem:[%s2636_s15 + $0xd0] sm:$0xff] %vm310_vm1, %v1441_v18  ;;  %v1194_v34 = vmul.f32 %v1192_v41, %v2674_v10  ;;  %v2719_v20 = vmul.f32 %v2533_v62, %v2674_v10  ;;  %v2723_v50 = vmul.f32 %v2459_v3, %v2674_v10 }
 0x17d   : > { %v1511_v48 = vmul.f32 %v1872_v52, %v2575_v47  ;;  %v1512_v57 = vmul.f32 %v1872_v52, %v2578_v58  ;;  %v2729_v1 = vmul.f32 %v2659_v40, %v2674_v10  ;;  %v2733_v28 = vmul.f32 %v2606_v9, %v2674_v10 }
 0x17e   : > { %v1195_v35 = vadd.f32 %v1193_v15, %v2428_v54  ;;  %v916_v62 = vadd.f32 %v2711_v36, %v904_v21  ;;  %v956_v8 = vadd.f32 %v954_v6, %v2711_v36  ;;  %v996_v3 = vadd.f32 %v994_v4, %v2711_v36 }
 0x17f   : > { %v1513_v47 = vmul.f32 %v1511_v48, %v2411_v23  ;;  %v2741_v58 = vmul.f32 %v1512_v57, %v2674_v10  ;;  %v1036_v51 = vadd.f32 %v1034_v7, %v2711_v36  ;;  %v1076_v40 = vadd.f32 %v1074_v56, %v2711_v36 }
 0x180   : > { %v1874_v9 = vpop.eup %1873  ;;  %vm1197_vm15 = vcmp.ge.f32.partialorder %v1195_v35, 0.0  ;;  %v1199_v39 = vmul.f32 0.2, %v1195_v35  ;;  %vm918_vm0 = vcmp.ge.f32.partialorder %v916_v62, 0.0  ;;  %v920_v13 = vmul.f32 0.2, %v916_v62 }
 0x181   : > { %v1151_v63 = vmul.f32 %v1874_v9, %v2587_v24  ;;  %v1152_v31 = vmul.f32 %v1874_v9, %v2590_v53  ;;  %v1515_v30 = vadd.f32 %v1513_v47, %v2428_v54  ;;  %vm958_vm2 = vcmp.ge.f32.partialorder %v956_v8, 0.0 }
 0x182   : > { %v1201_v29 = vsel %vm1197_vm15, %v1195_v35, %v1199_v39  ;;  %v922_v61 = vsel %vm918_vm0, %v916_v62, %v920_v13  ;;  %v960_v45 = vmul.f32 0.2, %v956_v8  ;;  %vm998_vm3 = vcmp.ge.f32.partialorder %v996_v3, 0.0 }
 0x183   : > { %v1153_v38 = vmul.f32 %v1151_v63, %v2411_v23  ;;  %1203 = vst.msk [vmem:[%s2636_s15 + $0x70] sm:$0xff] %vm310_vm1, %v1201_v29  ;;  %vm1517_vm4 = vcmp.ge.f32.partialorder %v1515_v30, 0.0  ;;  %v1519_v49 = vmul.f32 0.2, %v1515_v30  ;;  %v1154_v12 = vmul.f32 %v1152_v31, %v2674_v10  ;;  %924 = vst.msk [vmem:[%s2636_s15 + $0x8] sm:$0xff] %vm310_vm1, %v922_v61 }
 0x184   : > { %v962_v24 = vsel %vm958_vm2, %v956_v8, %v960_v45  ;;  %v1000_v53 = vmul.f32 0.2, %v996_v3  ;;  %vm1038_vm5 = vcmp.ge.f32.partialorder %v1036_v51, 0.0  ;;  %v1040_v14 = vmul.f32 0.2, %v1036_v51 }
 0x185   : > { %v1155_v5 = vadd.f32 %v1153_v38, %v2428_v54  ;;  %v1521_v60 = vsel %vm1517_vm4, %v1515_v30, %v1519_v49  ;;  %964 = vst.msk [vmem:[%s2636_s15 + $0x18] sm:$0xff] %vm310_vm1, %v962_v24  ;;  %vm1078_vm6 = vcmp.ge.f32.partialorder %v1076_v40, 0.0  ;;  %v1080_v16 = vmul.f32 0.2, %v1076_v40 }
 0x186   : > { %1523 = vst.msk [vmem:[%s2636_s15 + $0xf0] sm:$0xff] %vm310_vm1, %v1521_v60  ;;  %v1002_v44 = vsel %vm998_vm3, %v996_v3, %v1000_v53  ;;  %v1042_v33 = vsel %vm1038_vm5, %v1036_v51, %v1040_v14  ;;  %v1116_v37 = vadd.f32 %v1114_v27, %v2711_v36  ;;  %v1156_v59 = vadd.f32 %v1154_v12, %v2711_v36 }
 0x187   : > { %v1876_v25 = vpop.eup %1875  ;;  %vm1157_vm7 = vcmp.ge.f32.partialorder %v1155_v5, 0.0  ;;  %v1159_v42 = vmul.f32 0.2, %v1155_v5  ;;  %1004 = vst.msk [vmem:[%s2636_s15 + $0x28] sm:$0xff] %vm310_vm1, %v1002_v44  ;;  %1044 = vst.msk [vmem:[%s2636_s15 + $0x38] sm:$0xff] %vm310_vm1, %v1042_v33  ;;  %v1082_v26 = vsel %vm1078_vm6, %v1076_v40, %v1080_v16  ;;  %v1196_v21 = vadd.f32 %v1194_v34, %v2711_v36 }
 0x188   : > { %v1471_v6 = vmul.f32 %v1876_v25, %v2618_v17  ;;  %v1472_v46 = vmul.f32 %v1876_v25, %v2621_v0  ;;  %1084 = vst.msk [vmem:[%s2636_s15 + $0x48] sm:$0xff] %vm310_vm1, %v1082_v26  ;;  %vm1118_vm8 = vcmp.ge.f32.partialorder %v1116_v37, 0.0  ;;  %v1120_v11 = vmul.f32 0.2, %v1116_v37 }
 0x189   : > { %v1161_v32 = vsel %vm1157_vm7, %v1155_v5, %v1159_v42  ;;  %vm1158_vm9 = vcmp.ge.f32.partialorder %v1156_v59, 0.0  ;;  %v1160_v19 = vmul.f32 0.2, %v1156_v59  ;;  %vm1198_vm10 = vcmp.ge.f32.partialorder %v1196_v21, 0.0 }
 0x18a   : > { %v1473_v4 = vmul.f32 %v1471_v6, %v2411_v23  ;;  %1163 = vst.msk [vmem:[%s2636_s15 + $0x60] sm:$0xff] %vm310_vm1, %v1161_v32  ;;  %v1474_v7 = vmul.f32 %v1472_v46, %v2674_v10  ;;  %v1122_v56 = vsel %vm1118_vm8, %v1116_v37, %v1120_v11  ;;  %v1200_v17 = vmul.f32 0.2, %v1196_v21 }
 0x18b   : > { %1124 = vst.msk [vmem:[%s2636_s15 + $0x58] sm:$0xff] %vm310_vm1, %v1122_v56  ;;  %v1162_v0 = vsel %vm1158_vm9, %v1156_v59, %v1160_v19  ;;  %v1236_v2 = vadd.f32 %v2705_v43, %v2711_v36  ;;  %v1276_v41 = vadd.f32 %v2709_v22, %v2711_v36  ;;  %v1316_v55 = vadd.f32 %v2719_v20, %v2711_v36 }
 0x18c   : > { %v1475_v23 = vadd.f32 %v1473_v4, %v2428_v54  ;;  %1164 = vst.msk [vmem:[%s2636_s15 + $0x68] sm:$0xff] %vm310_vm1, %v1162_v0  ;;  %v1202_v18 = vsel %vm1198_vm10, %v1196_v21, %v1200_v17  ;;  %v1356_v10 = vadd.f32 %v2723_v50, %v2711_v36  ;;  %v1396_v27 = vadd.f32 %v2729_v1, %v2711_v36 }
 0x18d   : > { %1204 = vst.msk [vmem:[%s2636_s15 + $0x78] sm:$0xff] %vm310_vm1, %v1202_v18  ;;  %vm1238_vm11 = vcmp.ge.f32.partialorder %v1236_v2, 0.0  ;;  %v1240_v43 = vmul.f32 0.2, %v1236_v2  ;;  %vm1278_vm12 = vcmp.ge.f32.partialorder %v1276_v41, 0.0  ;;  %vm1318_vm14 = vcmp.ge.f32.partialorder %v1316_v55, 0.0 }
 0x18e   : > { %v1280_v22 = vmul.f32 0.2, %v1276_v41  ;;  %vm1477_vm13 = vcmp.ge.f32.partialorder %v1475_v23, 0.0  ;;  %v1479_v54 = vmul.f32 0.2, %v1475_v23  ;;  %vm1358_vm15 = vcmp.ge.f32.partialorder %v1356_v10, 0.0 }
 0x18f   : > { %v1320_v52 = vmul.f32 0.2, %v1316_v55  ;;  %v1242_v15 = vsel %vm1238_vm11, %v1236_v2, %v1240_v43  ;;  %v1360_v20 = vmul.f32 0.2, %v1356_v10  ;;  %vm1398_vm0 = vcmp.ge.f32.partialorder %v1396_v27, 0.0 }
 0x190   : > { %v1282_v34 = vsel %vm1278_vm12, %v1276_v41, %v1280_v22  ;;  %v1481_v50 = vsel %vm1477_vm13, %v1475_v23, %v1479_v54  ;;  %1244 = vst.msk [vmem:[%s2636_s15 + $0x88] sm:$0xff] %vm310_vm1, %v1242_v15  ;;  %v1400_v57 = vmul.f32 0.2, %v1396_v27  ;;  %v1436_v35 = vadd.f32 %v2733_v28, %v2711_v36 }
 0x191   : > { %1284 = vst.msk [vmem:[%s2636_s15 + $0x98] sm:$0xff] %vm310_vm1, %v1282_v34  ;;  %v1322_v48 = vsel %vm1318_vm14, %v1316_v55, %v1320_v52  ;;  %1483 = vst.msk [vmem:[%s2636_s15 + $0xe0] sm:$0xff] %vm310_vm1, %v1481_v50  ;;  %v1362_v1 = vsel %vm1358_vm15, %v1356_v10, %v1360_v20  ;;  %v1476_v62 = vadd.f32 %v1474_v7, %v2711_v36 }
 0x192   : > { %1324 = vst.msk [vmem:[%s2636_s15 + $0xa8] sm:$0xff] %vm310_vm1, %v1322_v48  ;;  %v1516_v8 = vadd.f32 %v2741_v58, %v2711_v36  ;;  %1364 = vst.msk [vmem:[%s2636_s15 + $0xb8] sm:$0xff] %vm310_vm1, %v1362_v1  ;;  %v1402_v3 = vsel %vm1398_vm0, %v1396_v27, %v1400_v57  ;;  %vm1438_vm2 = vcmp.ge.f32.partialorder %v1436_v35, 0.0  ;;  %v1440_v47 = vmul.f32 0.2, %v1436_v35 }
 0x193   : > { %1404 = vst.msk [vmem:[%s2636_s15 + $0xc8] sm:$0xff] %vm310_vm1, %v1402_v3  ;;  %vm1478_vm3 = vcmp.ge.f32.partialorder %v1476_v62, 0.0  ;;  %v1480_v28 = vmul.f32 0.2, %v1476_v62 }
 0x194   : > { %vm1518_vm4 = vcmp.ge.f32.partialorder %v1516_v8, 0.0  ;;  %v1520_v51 = vmul.f32 0.2, %v1516_v8  ;;  %v1442_v36 = vsel %vm1438_vm2, %v1436_v35, %v1440_v47 }
 0x195   : > { %v1482_v58 = vsel %vm1478_vm3, %v1476_v62, %v1480_v28  ;;  %1444 = vst.msk [vmem:[%s2636_s15 + $0xd8] sm:$0xff] %vm310_vm1, %v1442_v36 }
 0x196   : > { %1484 = vst.msk [vmem:[%s2636_s15 + $0xe8] sm:$0xff] %vm310_vm1, %v1482_v58  ;;  %v1522_v40 = vsel %vm1518_vm4, %v1516_v8, %v1520_v51 }
 0x197   : > { %1524 = vst.msk [vmem:[%s2636_s15 + $0xf8] sm:$0xff] %vm310_vm1, %v1522_v40 }
 0x198   : > { %1890 = shalt.err (!%p1887_p5)
}
 0x199   : > { %s1891_s10 = scalar_lea.hbm %s2814_s21, 4096  ;;  %s1895_s13 = scalar_lea.hbm %s2876_s5, 8192 }
 0x19a   : > { %p1892_p6 = scmp.ne.s32.totalorder %s2814_s21, %s1891_s10  ;;  %p1896_p10 = scmp.lt.s32.totalorder %s2814_s21, %s2876_s5 }
 0x19b   : > { %p1897_p11 = scmp.lt.s32.totalorder %s1895_s13, %s1891_s10 }
 0x19c   : > { %p1893_p7 = pnand %p1892_p6, %p2030_p4 }
 0x19d   : > { %p1898_p12 = por %p1897_p11, %p1896_p10 }
 0x19e   : > { %p1894_p9 = pneg %p1893_p7 }
 0x1a0   : > { %p1899_p13 = pnand %p1898_p12, %p1894_p9 }
 0x1a2   : > { %1902 = shalt.err (!%p1899_p13)
}
 0x1a3   : > { %s1958_s16 = smov 128   ;;  %s1959_s24 = smov 8  }
 0x1a4   : > { %1765 = dma.vmem_to_hbm [thread:$0]  (%p2030_p4), %s2816_s17, 4096, %s2814_s21, %s2826_s27, %s1958_s16, %s1958_s16, %s1959_s24  }
 0x1a5 PF: > { %p1771_p0 = scmp.ge.s32.totalorder %s1953_s23, 2  ;;  %s1555_s25 = sand.u32 1, %s1933_s18  }
 0x1a6   : > { %s1556_s29 = scalar_lea.sflag [#allocation4], %s1555_s25 }
 0x1a7   : > { %p1768_p1 = pnand %p1771_p0, %p2037_p8 }
 0x1a9   : > { %p1769_p2 = pneg %p1768_p1 }
 0x1ab   : > { %1928 = dma.done.wait (%p1769_p2), %s1556_s29, 4096  }
 0x1ac   : > { %1930 = vsyncadd (%p1769_p2), %s1556_s29, 4294963200  ;;  %s18_s23 = sadd.s32 1, %s1953_s23   ;;  %s2879_s18 = smov %s1937_s19 }
 0x1ad   : > { %p15_p3 = scmp.ge.s32.totalorder %s18_s23, 4   ;;  %s2880_s19 = smov %s1941_s20 }
 0x1ae   : > { %s2881_s20 = smov %s2043_s6  ;;  %s2882_s21 = smov %s1949_s22 }
 0x1af   : > { %s2883_s22 = smov %s2885_s26  ;;  %17 = sbr.rel (!%p15_p3) target bundleno = 4 (0x4), region = 89 }
 0x1b4   :  { %1561 = vsyncpa [#allocation4], 1 }
 0x1b5   :  { %1563 = vsyncpa [#allocation4 + $0x1], 1 }

</bundles_post_ra>
